<compile_context>
chip_gen: v7x
topology: tpu7x:2x2x1
jax: 0.10.0
libtpu: 0.0.40
codegen_flags: <defaults>
</compile_context>

<pallas_src>
import jax
import jax.numpy as jnp
from jax.experimental import pallas as pl
from jax.experimental.pallas import tpu as pltpu


def _round_up(x, m):
    return ((x + m - 1) // m) * m


_VMEM_SPEC = pl.BlockSpec(memory_space=pltpu.MemorySpace.VMEM)

# Kernel-internal gate order is [i, f, o, g]  (PyTorch stores i, f, g, o).
# Contiguous [i|f|o] lanes let one sigmoid cover a 3*Hp slab, one tanh -> Hp.
_GATE_SRC = (0, 1, 3, 2)          # kernel slot -> PyTorch gate index


# ---------------------------------------------------------------------------
# Pallas kernel: full LSTM sequence in a single invocation (no grid)
# ---------------------------------------------------------------------------
def _lstm_seq_kernel(x_ref, h0_ref, c0_ref, w_ih_ref, b_ref, w_hh_ref,
                     h_all_ref, c_out_ref, gx_ref, h_ref, c_ref):
    """
    x_ref     : (T*Bp, I)     all timesteps, batch padded to Bp (multiple of 8)
    h0_ref    : (Bp, Hp)      initial hidden state (lane padded)
    c0_ref    : (Bp, Hp)      initial cell state   (lane padded)
    w_ih_ref  : (I, 4*Hp)     input->gates weights, gate order [i,f,o,g]
    b_ref     : (1, 4*Hp)     folded bias (b_ih + b_hh), same gate order
    w_hh_ref  : (Hp, 4*Hp)    hidden->gates weights, same gate order
    h_all_ref : (T*Bp, Hp)    per-step hidden output (lane dense)
    c_out_ref : (Bp, Hp)      final cell state output
    gx_ref    : (T*Bp, 4*Hp)  f32 scratch: hoisted input projection
    h_ref     : (Bp, Hp)      f32 scratch: running hidden state
    c_ref     : (Bp, Hp)      f32 scratch: running cell state
    """
    Bp, Hp = c_ref.shape
    T = gx_ref.shape[0] // Bp

    # Phase 1: input projection for ALL timesteps as one dense MXU matmul
    # (M = T*Bp instead of a tiny per-step M = B matmul); bias folded here so
    # the serial loop only does h @ W_hh.
    gx_ref[...] = (
        jnp.dot(x_ref[...], w_ih_ref[...], preferred_element_type=jnp.float32)
        + b_ref[...])

    # Phase 2: serial recurrence; state stays in f32 VMEM scratch, never HBM.
    h_ref[...] = h0_ref[...].astype(jnp.float32)
    c_ref[...] = c0_ref[...].astype(jnp.float32)

    def step(t, carry):
        row = pl.multiple_of(t * Bp, 8)          # Bp % 8 == 0 -> aligned slice
        gates = gx_ref[pl.ds(row, Bp), :] + jnp.dot(
            h_ref[...], w_hh_ref[...], preferred_element_type=jnp.float32)
        ifo = jax.nn.sigmoid(gates[:, :3 * Hp])  # one EUP slab: i | f | o
        g = jnp.tanh(gates[:, 3 * Hp:])
        i = ifo[:, 0 * Hp:1 * Hp]
        f = ifo[:, 1 * Hp:2 * Hp]
        o = ifo[:, 2 * Hp:3 * Hp]
        c_new = f * c_ref[...] + i * g
        h_new = o * jnp.tanh(c_new)
        c_ref[...] = c_new
        h_ref[...] = h_new
        h_all_ref[pl.ds(row, Bp), :] = h_new.astype(h_all_ref.dtype)
        return carry

    jax.lax.fori_loop(0, T, step, 0, unroll=(T <= 32))
    c_out_ref[...] = c_ref[...].astype(c_out_ref.dtype)


# ---------------------------------------------------------------------------
# pallas_call wrapper
# ---------------------------------------------------------------------------
def _lstm_seq_call(x_seq, h0, c0, params):
    """x_seq: (T, B, I); h0/c0: (B, H) unpadded. Returns (h_all (T,B,H), c_n (B,H))."""
    T, B, I = x_seq.shape
    H = params["H"]
    Hp = params["w_hh_packed"].shape[0]
    Bp = _round_up(B, 8)                         # sublane-dense batch

    x2d = jnp.pad(x_seq, ((0, 0), (0, Bp - B), (0, 0))).reshape(T * Bp, I)
    h0p = jnp.pad(h0, ((0, Bp - B), (0, Hp - H)))
    c0p = jnp.pad(c0, ((0, Bp - B), (0, Hp - H)))

    h_all, c_n = pl.pallas_call(
        _lstm_seq_kernel,
        out_shape=(jax.ShapeDtypeStruct((T * Bp, Hp), x_seq.dtype),
                   jax.ShapeDtypeStruct((Bp, Hp), x_seq.dtype)),
        in_specs=[_VMEM_SPEC] * 6,
        out_specs=(_VMEM_SPEC, _VMEM_SPEC),
        scratch_shapes=[pltpu.VMEM((T * Bp, 4 * Hp), jnp.float32),  # gates_x
                        pltpu.VMEM((Bp, Hp), jnp.float32),          # h carry
                        pltpu.VMEM((Bp, Hp), jnp.float32)],         # c carry
        # Explicit scoped-VMEM limit; everything here is well under it.  For
        # large H (v7x 64 MiB physical VMEM) raise this and switch the packed
        # weights to bf16 / per-gate tiles.
        compiler_params=pltpu.CompilerParams(
            vmem_limit_bytes=32 * 1024 * 1024),
    )(x2d, h0p, c0p,
      params["w_ih_packed"], params["b_packed"], params["w_hh_packed"])

    h_all = h_all.reshape(T, Bp, Hp)
    return h_all[:, :B, :H], c_n[:B, :H]


def lstm_controller_forward(x, hidden, params):
    """Equivalent of LSTMController.forward(inputs, hidden) (seq_len = 1).

    x: (B, input_size); hidden: None or (h0, c0), each (1, B, H).
    Returns (h_state (B, H), (h_n, c_n) each (1, B, H)).
    """
    B = x.shape[0]
    H = params["H"]
    if hidden is None:
        h0 = jnp.zeros((1, B, H), dtype=x.dtype)
        c0 = jnp.zeros((1, B, H), dtype=x.dtype)
    else:
        h0, c0 = hidden
    # TODO(synk): controller_size > 1 (multi-layer) hidden state is ignored,
    # matching the single-layer nn.LSTM actually instantiated by the module.
    h_all, c_n = _lstm_seq_call(x[None], h0[0], c0[0], params)
    h_state = h_all[0]
    return h_state, (h_state[None], c_n[None])


def lstm_controller_forward_seq(x_seq, hidden, params):
    """Multi-timestep rollout, fully fused into a single pallas_call.

    x_seq: (T, B, input_size) -> (h_all (T,B,H), (h_n, c_n) each (1,B,H)).
    """
    B = x_seq.shape[1]
    H = params["H"]
    if hidden is None:
        h0 = jnp.zeros((1, B, H), dtype=x_seq.dtype)
        c0 = jnp.zeros((1, B, H), dtype=x_seq.dtype)
    else:
        h0, c0 = hidden
    h_all, c_n = _lstm_seq_call(x_seq, h0[0], c0[0], params)
    return h_all, (h_all[-1][None], c_n[None])


def lstm_controller_output(read_data, params):
    """Equivalent of LSTMController.output(read_data).

    Perf review: at (B, 48) @ (48, 8) the pallas_call launch overhead plus the
    8-lane masked output store cost more than the matmul itself, so this stays
    a plain XLA dot + sigmoid fusion.
    """
    return jax.nn.sigmoid(read_data @ params["out_w_t"] + params["out_b"])


def create_new_state(params, batch_size):
    """Equivalent of LSTMController.create_new_state(batch_size)."""
    lstm_h = jnp.tile(params["lstm_h_bias"], (1, batch_size, 1))
    lstm_c = jnp.tile(params["lstm_c_bias"], (1, batch_size, 1))
    return lstm_h, lstm_c


# ---------------------------------------------------------------------------
# Parameter init (mirrors the nn.Module __init__) + weight packing
# ---------------------------------------------------------------------------
def _pack_lstm_weights(w_ih, w_hh, b_ih, b_hh, H, dtype):
    """Repack PyTorch LSTM weights into the kernel layout.

    Columns: 4 gate blocks in order [i, f, o, g], each lane-padded to
    Hp = round_up(H, 128).  W_hh's contraction axis is also padded to Hp so
    the recurrent matmul is a single lane/sublane-aligned (Hp, 4*Hp) dot.
    The bias row is (b_ih + b_hh), repacked the same way.
    """
    Hp = _round_up(H, 128)

    def pack_cols(mat_t, k_pad):
        k = mat_t.shape[0]
        out = jnp.zeros((k_pad, 4 * Hp), dtype)
        for slot, src in enumerate(_GATE_SRC):
            out = out.at[:k, slot * Hp: slot * Hp + H].set(
                mat_t[:, src * H:(src + 1) * H].astype(dtype))
        return out

    w_ih_packed = pack_cols(w_ih.T, w_ih.shape[1])        # (I, 4*Hp)
    w_hh_packed = pack_cols(w_hh.T, Hp)                   # (Hp, 4*Hp)
    b_packed = pack_cols((b_ih + b_hh)[None, :], 1)       # (1, 4*Hp)
    return w_ih_packed, w_hh_packed, b_packed


def init_params(key, input_size, output_size, controller_size,
                read_data_size, num_outputs, outp_layer_size, dtype=jnp.float32):
    H = output_size
    k_lstm = 1.0 / jnp.sqrt(jnp.asarray(H, dtype))
    k_lin = 1.0 / jnp.sqrt(jnp.asarray(outp_layer_size, dtype))
    keys = jax.random.split(key, 8)

    w_ih = jax.random.uniform(keys[0], (4 * H, input_size), dtype, -k_lstm, k_lstm)
    w_hh = jax.random.uniform(keys[1], (4 * H, H), dtype, -k_lstm, k_lstm)
    b_ih = jax.random.uniform(keys[2], (4 * H,), dtype, -k_lstm, k_lstm)
    b_hh = jax.random.uniform(keys[3], (4 * H,), dtype, -k_lstm, k_lstm)
    out_w = jax.random.uniform(keys[4], (num_outputs, outp_layer_size), dtype, -k_lin, k_lin)
    out_b = jax.random.uniform(keys[5], (num_outputs,), dtype, -k_lin, k_lin)

    # TODO(synk): for large H on v6e/v7x, store the packed weights in bfloat16
    # (keeping preferred_element_type=f32) and/or tile the 4*Hp axis per gate
    # to fit v7x's 64 MiB VMEM; f32 is kept here for exact parity at small H.
    w_ih_packed, w_hh_packed, b_packed = _pack_lstm_weights(
        w_ih, w_hh, b_ih, b_hh, H, dtype)

    return {
        "H": H,
        "input_size": input_size,
        # packed weights consumed by the kernel (gate order [i, f, o, g])
        "w_ih_packed": w_ih_packed,
        "w_hh_packed": w_hh_packed,
        "b_packed": b_packed,
        # raw (transposed) weights kept for the pure-JAX reference
        "w_ih_t": w_ih.T,                                   # (input_size, 4H)
        "w_hh_t": w_hh.T,                                   # (H, 4H)
        "b_gates": (b_ih + b_hh)[None, :],                  # (1, 4H)
        # output projection
        "out_w_t": out_w.T,                                 # (outp_layer_size, num_outputs)
        "out_b": out_b[None, :],                            # (1, num_outputs)
        # learned initial state
        "lstm_h_bias": jax.random.normal(keys[6], (controller_size, 1, H), dtype) * 0.05,
        "lstm_c_bias": jax.random.normal(keys[7], (controller_size, 1, H), dtype) * 0.05,
    }


# ---------------------------------------------------------------------------
# Pure-JAX references (PyTorch gate order i, f, g, o)
# ---------------------------------------------------------------------------
def _reference_step(x, h, c, params):
    H = params["H"]
    gates = x @ params["w_ih_t"] + h @ params["w_hh_t"] + params["b_gates"]
    i = jax.nn.sigmoid(gates[:, 0 * H:1 * H])
    f = jax.nn.sigmoid(gates[:, 1 * H:2 * H])
    g = jnp.tanh(gates[:, 2 * H:3 * H])
    o = jax.nn.sigmoid(gates[:, 3 * H:4 * H])
    c_new = f * c + i * g
    h_new = o * jnp.tanh(c_new)
    return h_new, c_new


def _reference_seq(x_seq, h0, c0, params):
    def step(carry, x):
        h, c = carry
        h2, c2 = _reference_step(x, h, c, params)
        return (h2, c2), h2
    (h_n, c_n), h_all = jax.lax.scan(step, (h0, c0), x_seq)
    return h_all, h_n, c_n


# ---------------------------------------------------------------------------
if __name__ == "__main__":
    INPUT_SIZE = 16
    OUTPUT_SIZE = 32          # == LSTM hidden size
    CONTROLLER_SIZE = 1       # stored as num_layers on the module (LSTM is 1 layer)
    READ_DATA_SIZE = 48
    NUM_OUTPUTS = 8
    OUTP_LAYER_SIZE = 48
    BATCH = 2
    SEQ = 8

    key = jax.random.PRNGKey(0)
    pkey, xkey, skey, rkey = jax.random.split(key, 4)
    params = init_params(pkey, INPUT_SIZE, OUTPUT_SIZE, CONTROLLER_SIZE,
                         READ_DATA_SIZE, NUM_OUTPUTS, OUTP_LAYER_SIZE)

    hidden = create_new_state(params, BATCH)

    # --- fused multi-timestep rollout (T steps in one pallas_call) ----------
    x_seq = jax.random.normal(skey, (SEQ, BATCH, INPUT_SIZE), jnp.float32)
    h_all, (h_n, c_n) = lstm_controller_forward_seq(x_seq, hidden, params)
    jax.block_until_ready((h_all, h_n, c_n))

    h_all_ref, hn_ref, cn_ref = _reference_seq(x_seq, hidden[0][0], hidden[1][0], params)
    assert jnp.allclose(h_all, h_all_ref, atol=1e-4), "seq h_all mismatch"
    assert jnp.allclose(h_n[0], hn_ref, atol=1e-4), "seq h_n mismatch"
    assert jnp.allclose(c_n[0], cn_ref, atol=1e-4), "seq c_n mismatch"
    assert h_all.shape == (SEQ, BATCH, OUTPUT_SIZE)

    # --- single step (exact module forward semantics) -----------------------
    x = jax.random.normal(xkey, (BATCH, INPUT_SIZE), jnp.float32)
    h_state, (h1, c1) = lstm_controller_forward(x, hidden, params)
    jax.block_until_ready((h_state, h1, c1))

    h_ref, c_ref = _reference_step(x, hidden[0][0], hidden[1][0], params)
    assert jnp.allclose(h_state, h_ref, atol=1e-4), "h_state mismatch"
    assert jnp.allclose(c1[0], c_ref, atol=1e-4), "c_n mismatch"
    assert h_state.shape == (BATCH, OUTPUT_SIZE)
    assert h1.shape == (1, BATCH, OUTPUT_SIZE) and c1.shape == (1, BATCH, OUTPUT_SIZE)

    # --- .output() path ------------------------------------------------------
    read_data = jax.random.normal(rkey, (BATCH, OUTP_LAYER_SIZE), jnp.float32)
    out = lstm_controller_output(read_data, params)
    jax.block_until_ready(out)
    out_ref = jax.nn.sigmoid(read_data @ params["out_w_t"] + params["out_b"])
    assert jnp.allclose(out, out_ref, atol=1e-4), "output() mismatch"
    assert out.shape == (BATCH, NUM_OUTPUTS)

    print("KERNEL_OK")
</pallas_src>

<mosaic_0001>
module attributes {stable_mosaic.version = 11 : i64} {
  func.func @_lstm_seq_kernel(%arg0: memref<64x16xf32, #tpu.memory_space<vmem>>, %arg1: memref<8x128xf32, #tpu.memory_space<vmem>>, %arg2: memref<8x128xf32, #tpu.memory_space<vmem>>, %arg3: memref<16x512xf32, #tpu.memory_space<vmem>>, %arg4: memref<1x512xf32, #tpu.memory_space<vmem>>, %arg5: memref<128x512xf32, #tpu.memory_space<vmem>>, %arg6: memref<64x128xf32, #tpu.memory_space<vmem>>, %arg7: memref<8x128xf32, #tpu.memory_space<vmem>>, %arg8: memref<64x512xf32, #tpu.memory_space<vmem>>, %arg9: memref<8x128xf32, #tpu.memory_space<vmem>>, %arg10: memref<8x128xf32, #tpu.memory_space<vmem>>) attributes {dimension_semantics = [], scalar_prefetch = 0 : i64, scratch_operands = 3 : i64, tpu.core_type = #tpu.core_type<tc>} {
    %c0 = arith.constant 0 : index
    %c0_0 = arith.constant 0 : index
    %0 = vector.load %arg0[%c0, %c0_0] : memref<64x16xf32, #tpu.memory_space<vmem>>, vector<64x16xf32>
    %c0_1 = arith.constant 0 : index
    %c0_2 = arith.constant 0 : index
    %1 = vector.load %arg3[%c0_1, %c0_2] : memref<16x512xf32, #tpu.memory_space<vmem>>, vector<16x512xf32>
    %cst = arith.constant dense<0.000000e+00> : vector<64x512xf32>
    %2 = tpu.matmul %0, %1, %cst {dimension_numbers = #tpu.dot_dimension_numbers<[1], [0], [0], [1], [0, 0, 1, 1], [], []>} : vector<64x16xf32>, vector<16x512xf32>, vector<64x512xf32> -> vector<64x512xf32>
    %c0_3 = arith.constant 0 : index
    %c0_4 = arith.constant 0 : index
    %3 = vector.load %arg4[%c0_3, %c0_4] : memref<1x512xf32, #tpu.memory_space<vmem>>, vector<1x512xf32>
    %4 = vector.broadcast %3 : vector<1x512xf32> to vector<64x512xf32>
    %5 = arith.addf %2, %4 : vector<64x512xf32>
    %c0_5 = arith.constant 0 : index
    %c0_6 = arith.constant 0 : index
    %6 = vector.load %arg8[%c0_5, %c0_6] : memref<64x512xf32, #tpu.memory_space<vmem>>, vector<64x512xf32>
    tpu.vector_store %arg8[%c0_5, %c0_6], %5 {strides = array<i32>} : memref<64x512xf32, #tpu.memory_space<vmem>>, vector<64x512xf32>,
    %c0_7 = arith.constant 0 : index
    %c0_8 = arith.constant 0 : index
    %7 = vector.load %arg1[%c0_7, %c0_8] : memref<8x128xf32, #tpu.memory_space<vmem>>, vector<8x128xf32>
    %c0_9 = arith.constant 0 : index
    %c0_10 = arith.constant 0 : index
    %8 = vector.load %arg9[%c0_9, %c0_10] : memref<8x128xf32, #tpu.memory_space<vmem>>, vector<8x128xf32>
    tpu.vector_store %arg9[%c0_9, %c0_10], %7 {strides = array<i32>} : memref<8x128xf32, #tpu.memory_space<vmem>>, vector<8x128xf32>,
    %c0_11 = arith.constant 0 : index
    %c0_12 = arith.constant 0 : index
    %9 = vector.load %arg2[%c0_11, %c0_12] : memref<8x128xf32, #tpu.memory_space<vmem>>, vector<8x128xf32>
    %c0_13 = arith.constant 0 : index
    %c0_14 = arith.constant 0 : index
    %10 = vector.load %arg10[%c0_13, %c0_14] : memref<8x128xf32, #tpu.memory_space<vmem>>, vector<8x128xf32>
    tpu.vector_store %arg10[%c0_13, %c0_14], %9 {strides = array<i32>} : memref<8x128xf32, #tpu.memory_space<vmem>>, vector<8x128xf32>,
    %c0_i32 = arith.constant 0 : i32
    %c8_i32 = arith.constant 8 : i32
    %11 = arith.muli %c0_i32, %c8_i32 : i32
    %12 = tpu.assume_multiple %11, 8 : i32
    %13 = arith.index_cast %12 : i32 to index
    %c0_15 = arith.constant 0 : index
    %14 = vector.load %arg8[%13, %c0_15] : memref<64x512xf32, #tpu.memory_space<vmem>>, vector<8x512xf32>
    %c0_16 = arith.constant 0 : index
    %c0_17 = arith.constant 0 : index
    %15 = vector.load %arg9[%c0_16, %c0_17] : memref<8x128xf32, #tpu.memory_space<vmem>>, vector<8x128xf32>
    %c0_18 = arith.constant 0 : index
    %c0_19 = arith.constant 0 : index
    %16 = vector.load %arg5[%c0_18, %c0_19] : memref<128x512xf32, #tpu.memory_space<vmem>>, vector<128x512xf32>
    %cst_20 = arith.constant dense<0.000000e+00> : vector<8x512xf32>
    %17 = tpu.matmul %15, %16, %cst_20 {dimension_numbers = #tpu.dot_dimension_numbers<[1], [0], [0], [1], [0, 0, 1, 1], [], []>} : vector<8x128xf32>, vector<128x512xf32>, vector<8x512xf32> -> vector<8x512xf32>
    %18 = arith.addf %14, %17 : vector<8x512xf32>
    %19 = vector.extract_strided_slice %18 {offsets = [0, 0], sizes = [8, 384], strides = [1, 1]} : vector<8x512xf32> to vector<8x384xf32>
    %20 = arith.negf %19 : vector<8x384xf32>
    %21 = math.exp %20 : vector<8x384xf32>
    %cst_21 = arith.constant 1.000000e+00 : f32
    %22 = vector.broadcast %cst_21 : f32 to vector<8x384xf32>
    %23 = arith.addf %22, %21 : vector<8x384xf32>
    %24 = arith.divf %22, %23 : vector<8x384xf32>
    %25 = vector.extract_strided_slice %18 {offsets = [0, 384], sizes = [8, 128], strides = [1, 1]} : vector<8x512xf32> to vector<8x128xf32>
    %26 = math.tanh %25 : vector<8x128xf32>
    %27 = vector.extract_strided_slice %24 {offsets = [0, 0], sizes = [8, 128], strides = [1, 1]} : vector<8x384xf32> to vector<8x128xf32>
    %28 = vector.extract_strided_slice %24 {offsets = [0, 128], sizes = [8, 128], strides = [1, 1]} : vector<8x384xf32> to vector<8x128xf32>
    %29 = vector.extract_strided_slice %24 {offsets = [0, 256], sizes = [8, 128], strides = [1, 1]} : vector<8x384xf32> to vector<8x128xf32>
    %c0_22 = arith.constant 0 : index
    %c0_23 = arith.constant 0 : index
    %30 = vector.load %arg10[%c0_22, %c0_23] : memref<8x128xf32, #tpu.memory_space<vmem>>, vector<8x128xf32>
    %31 = arith.mulf %28, %30 : vector<8x128xf32>
    %32 = arith.mulf %27, %26 : vector<8x128xf32>
    %33 = arith.addf %31, %32 : vector<8x128xf32>
    %34 = math.tanh %33 : vector<8x128xf32>
    %35 = arith.mulf %29, %34 : vector<8x128xf32>
    %c0_24 = arith.constant 0 : index
    %c0_25 = arith.constant 0 : index
    %36 = vector.load %arg10[%c0_24, %c0_25] : memref<8x128xf32, #tpu.memory_space<vmem>>, vector<8x128xf32>
    tpu.vector_store %arg10[%c0_24, %c0_25], %33 {strides = array<i32>} : memref<8x128xf32, #tpu.memory_space<vmem>>, vector<8x128xf32>,
    %c0_26 = arith.constant 0 : index
    %c0_27 = arith.constant 0 : index
    %37 = vector.load %arg9[%c0_26, %c0_27] : memref<8x128xf32, #tpu.memory_space<vmem>>, vector<8x128xf32>
    tpu.vector_store %arg9[%c0_26, %c0_27], %35 {strides = array<i32>} : memref<8x128xf32, #tpu.memory_space<vmem>>, vector<8x128xf32>,
    %38 = arith.index_cast %12 : i32 to index
    %c0_28 = arith.constant 0 : index
    %39 = vector.load %arg6[%38, %c0_28] : memref<64x128xf32, #tpu.memory_space<vmem>>, vector<8x128xf32>
    tpu.vector_store %arg6[%38, %c0_28], %35 {strides = array<i32>} : memref<64x128xf32, #tpu.memory_space<vmem>>, vector<8x128xf32>,
    %c1_i32 = arith.constant 1 : i32
    %c8_i32_29 = arith.constant 8 : i32
    %40 = arith.muli %c1_i32, %c8_i32_29 : i32
    %41 = tpu.assume_multiple %40, 8 : i32
    %42 = arith.index_cast %41 : i32 to index
    %c0_30 = arith.constant 0 : index
    %43 = vector.load %arg8[%42, %c0_30] : memref<64x512xf32, #tpu.memory_space<vmem>>, vector<8x512xf32>
    %c0_31 = arith.constant 0 : index
    %c0_32 = arith.constant 0 : index
    %44 = vector.load %arg9[%c0_31, %c0_32] : memref<8x128xf32, #tpu.memory_space<vmem>>, vector<8x128xf32>
    %c0_33 = arith.constant 0 : index
    %c0_34 = arith.constant 0 : index
    %45 = vector.load %arg5[%c0_33, %c0_34] : memref<128x512xf32, #tpu.memory_space<vmem>>, vector<128x512xf32>
    %cst_35 = arith.constant dense<0.000000e+00> : vector<8x512xf32>
    %46 = tpu.matmul %44, %45, %cst_35 {dimension_numbers = #tpu.dot_dimension_numbers<[1], [0], [0], [1], [0, 0, 1, 1], [], []>} : vector<8x128xf32>, vector<128x512xf32>, vector<8x512xf32> -> vector<8x512xf32>
    %47 = arith.addf %43, %46 : vector<8x512xf32>
    %48 = vector.extract_strided_slice %47 {offsets = [0, 0], sizes = [8, 384], strides = [1, 1]} : vector<8x512xf32> to vector<8x384xf32>
    %49 = arith.negf %48 : vector<8x384xf32>
    %50 = math.exp %49 : vector<8x384xf32>
    %cst_36 = arith.constant 1.000000e+00 : f32
    %51 = vector.broadcast %cst_36 : f32 to vector<8x384xf32>
    %52 = arith.addf %51, %50 : vector<8x384xf32>
    %53 = arith.divf %51, %52 : vector<8x384xf32>
    %54 = vector.extract_strided_slice %47 {offsets = [0, 384], sizes = [8, 128], strides = [1, 1]} : vector<8x512xf32> to vector<8x128xf32>
    %55 = math.tanh %54 : vector<8x128xf32>
    %56 = vector.extract_strided_slice %53 {offsets = [0, 0], sizes = [8, 128], strides = [1, 1]} : vector<8x384xf32> to vector<8x128xf32>
    %57 = vector.extract_strided_slice %53 {offsets = [0, 128], sizes = [8, 128], strides = [1, 1]} : vector<8x384xf32> to vector<8x128xf32>
    %58 = vector.extract_strided_slice %53 {offsets = [0, 256], sizes = [8, 128], strides = [1, 1]} : vector<8x384xf32> to vector<8x128xf32>
    %c0_37 = arith.constant 0 : index
    %c0_38 = arith.constant 0 : index
    %59 = vector.load %arg10[%c0_37, %c0_38] : memref<8x128xf32, #tpu.memory_space<vmem>>, vector<8x128xf32>
    %60 = arith.mulf %57, %59 : vector<8x128xf32>
    %61 = arith.mulf %56, %55 : vector<8x128xf32>
    %62 = arith.addf %60, %61 : vector<8x128xf32>
    %63 = math.tanh %62 : vector<8x128xf32>
    %64 = arith.mulf %58, %63 : vector<8x128xf32>
    %c0_39 = arith.constant 0 : index
    %c0_40 = arith.constant 0 : index
    %65 = vector.load %arg10[%c0_39, %c0_40] : memref<8x128xf32, #tpu.memory_space<vmem>>, vector<8x128xf32>
    tpu.vector_store %arg10[%c0_39, %c0_40], %62 {strides = array<i32>} : memref<8x128xf32, #tpu.memory_space<vmem>>, vector<8x128xf32>,
    %c0_41 = arith.constant 0 : index
    %c0_42 = arith.constant 0 : index
    %66 = vector.load %arg9[%c0_41, %c0_42] : memref<8x128xf32, #tpu.memory_space<vmem>>, vector<8x128xf32>
    tpu.vector_store %arg9[%c0_41, %c0_42], %64 {strides = array<i32>} : memref<8x128xf32, #tpu.memory_space<vmem>>, vector<8x128xf32>,
    %67 = arith.index_cast %41 : i32 to index
    %c0_43 = arith.constant 0 : index
    %68 = vector.load %arg6[%67, %c0_43] : memref<64x128xf32, #tpu.memory_space<vmem>>, vector<8x128xf32>
    tpu.vector_store %arg6[%67, %c0_43], %64 {strides = array<i32>} : memref<64x128xf32, #tpu.memory_space<vmem>>, vector<8x128xf32>,
    %c2_i32 = arith.constant 2 : i32
    %c8_i32_44 = arith.constant 8 : i32
    %69 = arith.muli %c2_i32, %c8_i32_44 : i32
    %70 = tpu.assume_multiple %69, 8 : i32
    %71 = arith.index_cast %70 : i32 to index
    %c0_45 = arith.constant 0 : index
    %72 = vector.load %arg8[%71, %c0_45] : memref<64x512xf32, #tpu.memory_space<vmem>>, vector<8x512xf32>
    %c0_46 = arith.constant 0 : index
    %c0_47 = arith.constant 0 : index
    %73 = vector.load %arg9[%c0_46, %c0_47] : memref<8x128xf32, #tpu.memory_space<vmem>>, vector<8x128xf32>
    %c0_48 = arith.constant 0 : index
    %c0_49 = arith.constant 0 : index
    %74 = vector.load %arg5[%c0_48, %c0_49] : memref<128x512xf32, #tpu.memory_space<vmem>>, vector<128x512xf32>
    %cst_50 = arith.constant dense<0.000000e+00> : vector<8x512xf32>
    %75 = tpu.matmul %73, %74, %cst_50 {dimension_numbers = #tpu.dot_dimension_numbers<[1], [0], [0], [1], [0, 0, 1, 1], [], []>} : vector<8x128xf32>, vector<128x512xf32>, vector<8x512xf32> -> vector<8x512xf32>
    %76 = arith.addf %72, %75 : vector<8x512xf32>
    %77 = vector.extract_strided_slice %76 {offsets = [0, 0], sizes = [8, 384], strides = [1, 1]} : vector<8x512xf32> to vector<8x384xf32>
    %78 = arith.negf %77 : vector<8x384xf32>
    %79 = math.exp %78 : vector<8x384xf32>
    %cst_51 = arith.constant 1.000000e+00 : f32
    %80 = vector.broadcast %cst_51 : f32 to vector<8x384xf32>
    %81 = arith.addf %80, %79 : vector<8x384xf32>
    %82 = arith.divf %80, %81 : vector<8x384xf32>
    %83 = vector.extract_strided_slice %76 {offsets = [0, 384], sizes = [8, 128], strides = [1, 1]} : vector<8x512xf32> to vector<8x128xf32>
    %84 = math.tanh %83 : vector<8x128xf32>
    %85 = vector.extract_strided_slice %82 {offsets = [0, 0], sizes = [8, 128], strides = [1, 1]} : vector<8x384xf32> to vector<8x128xf32>
    %86 = vector.extract_strided_slice %82 {offsets = [0, 128], sizes = [8, 128], strides = [1, 1]} : vector<8x384xf32> to vector<8x128xf32>
    %87 = vector.extract_strided_slice %82 {offsets = [0, 256], sizes = [8, 128], strides = [1, 1]} : vector<8x384xf32> to vector<8x128xf32>
    %c0_52 = arith.constant 0 : index
    %c0_53 = arith.constant 0 : index
    %88 = vector.load %arg10[%c0_52, %c0_53] : memref<8x128xf32, #tpu.memory_space<vmem>>, vector<8x128xf32>
    %89 = arith.mulf %86, %88 : vector<8x128xf32>
    %90 = arith.mulf %85, %84 : vector<8x128xf32>
    %91 = arith.addf %89, %90 : vector<8x128xf32>
    %92 = math.tanh %91 : vector<8x128xf32>
    %93 = arith.mulf %87, %92 : vector<8x128xf32>
    %c0_54 = arith.constant 0 : index
    %c0_55 = arith.constant 0 : index
    %94 = vector.load %arg10[%c0_54, %c0_55] : memref<8x128xf32, #tpu.memory_space<vmem>>, vector<8x128xf32>
    tpu.vector_store %arg10[%c0_54, %c0_55], %91 {strides = array<i32>} : memref<8x128xf32, #tpu.memory_space<vmem>>, vector<8x128xf32>,
    %c0_56 = arith.constant 0 : index
    %c0_57 = arith.constant 0 : index
    %95 = vector.load %arg9[%c0_56, %c0_57] : memref<8x128xf32, #tpu.memory_space<vmem>>, vector<8x128xf32>
    tpu.vector_store %arg9[%c0_56, %c0_57], %93 {strides = array<i32>} : memref<8x128xf32, #tpu.memory_space<vmem>>, vector<8x128xf32>,
    %96 = arith.index_cast %70 : i32 to index
    %c0_58 = arith.constant 0 : index
    %97 = vector.load %arg6[%96, %c0_58] : memref<64x128xf32, #tpu.memory_space<vmem>>, vector<8x128xf32>
    tpu.vector_store %arg6[%96, %c0_58], %93 {strides = array<i32>} : memref<64x128xf32, #tpu.memory_space<vmem>>, vector<8x128xf32>,
    %c3_i32 = arith.constant 3 : i32
    %c8_i32_59 = arith.constant 8 : i32
    %98 = arith.muli %c3_i32, %c8_i32_59 : i32
    %99 = tpu.assume_multiple %98, 8 : i32
    %100 = arith.index_cast %99 : i32 to index
    %c0_60 = arith.constant 0 : index
    %101 = vector.load %arg8[%100, %c0_60] : memref<64x512xf32, #tpu.memory_space<vmem>>, vector<8x512xf32>
    %c0_61 = arith.constant 0 : index
    %c0_62 = arith.constant 0 : index
    %102 = vector.load %arg9[%c0_61, %c0_62] : memref<8x128xf32, #tpu.memory_space<vmem>>, vector<8x128xf32>
    %c0_63 = arith.constant 0 : index
    %c0_64 = arith.constant 0 : index
    %103 = vector.load %arg5[%c0_63, %c0_64] : memref<128x512xf32, #tpu.memory_space<vmem>>, vector<128x512xf32>
    %cst_65 = arith.constant dense<0.000000e+00> : vector<8x512xf32>
    %104 = tpu.matmul %102, %103, %cst_65 {dimension_numbers = #tpu.dot_dimension_numbers<[1], [0], [0], [1], [0, 0, 1, 1], [], []>} : vector<8x128xf32>, vector<128x512xf32>, vector<8x512xf32> -> vector<8x512xf32>
    %105 = arith.addf %101, %104 : vector<8x512xf32>
    %106 = vector.extract_strided_slice %105 {offsets = [0, 0], sizes = [8, 384], strides = [1, 1]} : vector<8x512xf32> to vector<8x384xf32>
    %107 = arith.negf %106 : vector<8x384xf32>
    %108 = math.exp %107 : vector<8x384xf32>
    %cst_66 = arith.constant 1.000000e+00 : f32
    %109 = vector.broadcast %cst_66 : f32 to vector<8x384xf32>
    %110 = arith.addf %109, %108 : vector<8x384xf32>
    %111 = arith.divf %109, %110 : vector<8x384xf32>
    %112 = vector.extract_strided_slice %105 {offsets = [0, 384], sizes = [8, 128], strides = [1, 1]} : vector<8x512xf32> to vector<8x128xf32>
    %113 = math.tanh %112 : vector<8x128xf32>
    %114 = vector.extract_strided_slice %111 {offsets = [0, 0], sizes = [8, 128], strides = [1, 1]} : vector<8x384xf32> to vector<8x128xf32>
    %115 = vector.extract_strided_slice %111 {offsets = [0, 128], sizes = [8, 128], strides = [1, 1]} : vector<8x384xf32> to vector<8x128xf32>
    %116 = vector.extract_strided_slice %111 {offsets = [0, 256], sizes = [8, 128], strides = [1, 1]} : vector<8x384xf32> to vector<8x128xf32>
    %c0_67 = arith.constant 0 : index
    %c0_68 = arith.constant 0 : index
    %117 = vector.load %arg10[%c0_67, %c0_68] : memref<8x128xf32, #tpu.memory_space<vmem>>, vector<8x128xf32>
    %118 = arith.mulf %115, %117 : vector<8x128xf32>
    %119 = arith.mulf %114, %113 : vector<8x128xf32>
    %120 = arith.addf %118, %119 : vector<8x128xf32>
    %121 = math.tanh %120 : vector<8x128xf32>
    %122 = arith.mulf %116, %121 : vector<8x128xf32>
    %c0_69 = arith.constant 0 : index
    %c0_70 = arith.constant 0 : index
    %123 = vector.load %arg10[%c0_69, %c0_70] : memref<8x128xf32, #tpu.memory_space<vmem>>, vector<8x128xf32>
    tpu.vector_store %arg10[%c0_69, %c0_70], %120 {strides = array<i32>} : memref<8x128xf32, #tpu.memory_space<vmem>>, vector<8x128xf32>,
    %c0_71 = arith.constant 0 : index
    %c0_72 = arith.constant 0 : index
    %124 = vector.load %arg9[%c0_71, %c0_72] : memref<8x128xf32, #tpu.memory_space<vmem>>, vector<8x128xf32>
    tpu.vector_store %arg9[%c0_71, %c0_72], %122 {strides = array<i32>} : memref<8x128xf32, #tpu.memory_space<vmem>>, vector<8x128xf32>,
    %125 = arith.index_cast %99 : i32 to index
    %c0_73 = arith.constant 0 : index
    %126 = vector.load %arg6[%125, %c0_73] : memref<64x128xf32, #tpu.memory_space<vmem>>, vector<8x128xf32>
    tpu.vector_store %arg6[%125, %c0_73], %122 {strides = array<i32>} : memref<64x128xf32, #tpu.memory_space<vmem>>, vector<8x128xf32>,
    %c4_i32 = arith.constant 4 : i32
    %c8_i32_74 = arith.constant 8 : i32
    %127 = arith.muli %c4_i32, %c8_i32_74 : i32
    %128 = tpu.assume_multiple %127, 8 : i32
    %129 = arith.index_cast %128 : i32 to index
    %c0_75 = arith.constant 0 : index
    %130 = vector.load %arg8[%129, %c0_75] : memref<64x512xf32, #tpu.memory_space<vmem>>, vector<8x512xf32>
    %c0_76 = arith.constant 0 : index
    %c0_77 = arith.constant 0 : index
    %131 = vector.load %arg9[%c0_76, %c0_77] : memref<8x128xf32, #tpu.memory_space<vmem>>, vector<8x128xf32>
    %c0_78 = arith.constant 0 : index
    %c0_79 = arith.constant 0 : index
    %132 = vector.load %arg5[%c0_78, %c0_79] : memref<128x512xf32, #tpu.memory_space<vmem>>, vector<128x512xf32>
    %cst_80 = arith.constant dense<0.000000e+00> : vector<8x512xf32>
    %133 = tpu.matmul %131, %132, %cst_80 {dimension_numbers = #tpu.dot_dimension_numbers<[1], [0], [0], [1], [0, 0, 1, 1], [], []>} : vector<8x128xf32>, vector<128x512xf32>, vector<8x512xf32> -> vector<8x512xf32>
    %134 = arith.addf %130, %133 : vector<8x512xf32>
    %135 = vector.extract_strided_slice %134 {offsets = [0, 0], sizes = [8, 384], strides = [1, 1]} : vector<8x512xf32> to vector<8x384xf32>
    %136 = arith.negf %135 : vector<8x384xf32>
    %137 = math.exp %136 : vector<8x384xf32>
    %cst_81 = arith.constant 1.000000e+00 : f32
    %138 = vector.broadcast %cst_81 : f32 to vector<8x384xf32>
    %139 = arith.addf %138, %137 : vector<8x384xf32>
    %140 = arith.divf %138, %139 : vector<8x384xf32>
    %141 = vector.extract_strided_slice %134 {offsets = [0, 384], sizes = [8, 128], strides = [1, 1]} : vector<8x512xf32> to vector<8x128xf32>
    %142 = math.tanh %141 : vector<8x128xf32>
    %143 = vector.extract_strided_slice %140 {offsets = [0, 0], sizes = [8, 128], strides = [1, 1]} : vector<8x384xf32> to vector<8x128xf32>
    %144 = vector.extract_strided_slice %140 {offsets = [0, 128], sizes = [8, 128], strides = [1, 1]} : vector<8x384xf32> to vector<8x128xf32>
    %145 = vector.extract_strided_slice %140 {offsets = [0, 256], sizes = [8, 128], strides = [1, 1]} : vector<8x384xf32> to vector<8x128xf32>
    %c0_82 = arith.constant 0 : index
    %c0_83 = arith.constant 0 : index
    %146 = vector.load %arg10[%c0_82, %c0_83] : memref<8x128xf32, #tpu.memory_space<vmem>>, vector<8x128xf32>
    %147 = arith.mulf %144, %146 : vector<8x128xf32>
    %148 = arith.mulf %143, %142 : vector<8x128xf32>
    %149 = arith.addf %147, %148 : vector<8x128xf32>
    %150 = math.tanh %149 : vector<8x128xf32>
    %151 = arith.mulf %145, %150 : vector<8x128xf32>
    %c0_84 = arith.constant 0 : index
    %c0_85 = arith.constant 0 : index
    %152 = vector.load %arg10[%c0_84, %c0_85] : memref<8x128xf32, #tpu.memory_space<vmem>>, vector<8x128xf32>
    tpu.vector_store %arg10[%c0_84, %c0_85], %149 {strides = array<i32>} : memref<8x128xf32, #tpu.memory_space<vmem>>, vector<8x128xf32>,
    %c0_86 = arith.constant 0 : index
    %c0_87 = arith.constant 0 : index
    %153 = vector.load %arg9[%c0_86, %c0_87] : memref<8x128xf32, #tpu.memory_space<vmem>>, vector<8x128xf32>
    tpu.vector_store %arg9[%c0_86, %c0_87], %151 {strides = array<i32>} : memref<8x128xf32, #tpu.memory_space<vmem>>, vector<8x128xf32>,
    %154 = arith.index_cast %128 : i32 to index
    %c0_88 = arith.constant 0 : index
    %155 = vector.load %arg6[%154, %c0_88] : memref<64x128xf32, #tpu.memory_space<vmem>>, vector<8x128xf32>
    tpu.vector_store %arg6[%154, %c0_88], %151 {strides = array<i32>} : memref<64x128xf32, #tpu.memory_space<vmem>>, vector<8x128xf32>,
    %c5_i32 = arith.constant 5 : i32
    %c8_i32_89 = arith.constant 8 : i32
    %156 = arith.muli %c5_i32, %c8_i32_89 : i32
    %157 = tpu.assume_multiple %156, 8 : i32
    %158 = arith.index_cast %157 : i32 to index
    %c0_90 = arith.constant 0 : index
    %159 = vector.load %arg8[%158, %c0_90] : memref<64x512xf32, #tpu.memory_space<vmem>>, vector<8x512xf32>
    %c0_91 = arith.constant 0 : index
    %c0_92 = arith.constant 0 : index
    %160 = vector.load %arg9[%c0_91, %c0_92] : memref<8x128xf32, #tpu.memory_space<vmem>>, vector<8x128xf32>
    %c0_93 = arith.constant 0 : index
    %c0_94 = arith.constant 0 : index
    %161 = vector.load %arg5[%c0_93, %c0_94] : memref<128x512xf32, #tpu.memory_space<vmem>>, vector<128x512xf32>
    %cst_95 = arith.constant dense<0.000000e+00> : vector<8x512xf32>
    %162 = tpu.matmul %160, %161, %cst_95 {dimension_numbers = #tpu.dot_dimension_numbers<[1], [0], [0], [1], [0, 0, 1, 1], [], []>} : vector<8x128xf32>, vector<128x512xf32>, vector<8x512xf32> -> vector<8x512xf32>
    %163 = arith.addf %159, %162 : vector<8x512xf32>
    %164 = vector.extract_strided_slice %163 {offsets = [0, 0], sizes = [8, 384], strides = [1, 1]} : vector<8x512xf32> to vector<8x384xf32>
    %165 = arith.negf %164 : vector<8x384xf32>
    %166 = math.exp %165 : vector<8x384xf32>
    %cst_96 = arith.constant 1.000000e+00 : f32
    %167 = vector.broadcast %cst_96 : f32 to vector<8x384xf32>
    %168 = arith.addf %167, %166 : vector<8x384xf32>
    %169 = arith.divf %167, %168 : vector<8x384xf32>
    %170 = vector.extract_strided_slice %163 {offsets = [0, 384], sizes = [8, 128], strides = [1, 1]} : vector<8x512xf32> to vector<8x128xf32>
    %171 = math.tanh %170 : vector<8x128xf32>
    %172 = vector.extract_strided_slice %169 {offsets = [0, 0], sizes = [8, 128], strides = [1, 1]} : vector<8x384xf32> to vector<8x128xf32>
    %173 = vector.extract_strided_slice %169 {offsets = [0, 128], sizes = [8, 128], strides = [1, 1]} : vector<8x384xf32> to vector<8x128xf32>
    %174 = vector.extract_strided_slice %169 {offsets = [0, 256], sizes = [8, 128], strides = [1, 1]} : vector<8x384xf32> to vector<8x128xf32>
    %c0_97 = arith.constant 0 : index
    %c0_98 = arith.constant 0 : index
    %175 = vector.load %arg10[%c0_97, %c0_98] : memref<8x128xf32, #tpu.memory_space<vmem>>, vector<8x128xf32>
    %176 = arith.mulf %173, %175 : vector<8x128xf32>
    %177 = arith.mulf %172, %171 : vector<8x128xf32>
    %178 = arith.addf %176, %177 : vector<8x128xf32>
    %179 = math.tanh %178 : vector<8x128xf32>
    %180 = arith.mulf %174, %179 : vector<8x128xf32>
    %c0_99 = arith.constant 0 : index
    %c0_100 = arith.constant 0 : index
    %181 = vector.load %arg10[%c0_99, %c0_100] : memref<8x128xf32, #tpu.memory_space<vmem>>, vector<8x128xf32>
    tpu.vector_store %arg10[%c0_99, %c0_100], %178 {strides = array<i32>} : memref<8x128xf32, #tpu.memory_space<vmem>>, vector<8x128xf32>,
    %c0_101 = arith.constant 0 : index
    %c0_102 = arith.constant 0 : index
    %182 = vector.load %arg9[%c0_101, %c0_102] : memref<8x128xf32, #tpu.memory_space<vmem>>, vector<8x128xf32>
    tpu.vector_store %arg9[%c0_101, %c0_102], %180 {strides = array<i32>} : memref<8x128xf32, #tpu.memory_space<vmem>>, vector<8x128xf32>,
    %183 = arith.index_cast %157 : i32 to index
    %c0_103 = arith.constant 0 : index
    %184 = vector.load %arg6[%183, %c0_103] : memref<64x128xf32, #tpu.memory_space<vmem>>, vector<8x128xf32>
    tpu.vector_store %arg6[%183, %c0_103], %180 {strides = array<i32>} : memref<64x128xf32, #tpu.memory_space<vmem>>, vector<8x128xf32>,
    %c6_i32 = arith.constant 6 : i32
    %c8_i32_104 = arith.constant 8 : i32
    %185 = arith.muli %c6_i32, %c8_i32_104 : i32
    %186 = tpu.assume_multiple %185, 8 : i32
    %187 = arith.index_cast %186 : i32 to index
    %c0_105 = arith.constant 0 : index
    %188 = vector.load %arg8[%187, %c0_105] : memref<64x512xf32, #tpu.memory_space<vmem>>, vector<8x512xf32>
    %c0_106 = arith.constant 0 : index
    %c0_107 = arith.constant 0 : index
    %189 = vector.load %arg9[%c0_106, %c0_107] : memref<8x128xf32, #tpu.memory_space<vmem>>, vector<8x128xf32>
    %c0_108 = arith.constant 0 : index
    %c0_109 = arith.constant 0 : index
    %190 = vector.load %arg5[%c0_108, %c0_109] : memref<128x512xf32, #tpu.memory_space<vmem>>, vector<128x512xf32>
    %cst_110 = arith.constant dense<0.000000e+00> : vector<8x512xf32>
    %191 = tpu.matmul %189, %190, %cst_110 {dimension_numbers = #tpu.dot_dimension_numbers<[1], [0], [0], [1], [0, 0, 1, 1], [], []>} : vector<8x128xf32>, vector<128x512xf32>, vector<8x512xf32> -> vector<8x512xf32>
    %192 = arith.addf %188, %191 : vector<8x512xf32>
    %193 = vector.extract_strided_slice %192 {offsets = [0, 0], sizes = [8, 384], strides = [1, 1]} : vector<8x512xf32> to vector<8x384xf32>
    %194 = arith.negf %193 : vector<8x384xf32>
    %195 = math.exp %194 : vector<8x384xf32>
    %cst_111 = arith.constant 1.000000e+00 : f32
    %196 = vector.broadcast %cst_111 : f32 to vector<8x384xf32>
    %197 = arith.addf %196, %195 : vector<8x384xf32>
    %198 = arith.divf %196, %197 : vector<8x384xf32>
    %199 = vector.extract_strided_slice %192 {offsets = [0, 384], sizes = [8, 128], strides = [1, 1]} : vector<8x512xf32> to vector<8x128xf32>
    %200 = math.tanh %199 : vector<8x128xf32>
    %201 = vector.extract_strided_slice %198 {offsets = [0, 0], sizes = [8, 128], strides = [1, 1]} : vector<8x384xf32> to vector<8x128xf32>
    %202 = vector.extract_strided_slice %198 {offsets = [0, 128], sizes = [8, 128], strides = [1, 1]} : vector<8x384xf32> to vector<8x128xf32>
    %203 = vector.extract_strided_slice %198 {offsets = [0, 256], sizes = [8, 128], strides = [1, 1]} : vector<8x384xf32> to vector<8x128xf32>
    %c0_112 = arith.constant 0 : index
    %c0_113 = arith.constant 0 : index
    %204 = vector.load %arg10[%c0_112, %c0_113] : memref<8x128xf32, #tpu.memory_space<vmem>>, vector<8x128xf32>
    %205 = arith.mulf %202, %204 : vector<8x128xf32>
    %206 = arith.mulf %201, %200 : vector<8x128xf32>
    %207 = arith.addf %205, %206 : vector<8x128xf32>
    %208 = math.tanh %207 : vector<8x128xf32>
    %209 = arith.mulf %203, %208 : vector<8x128xf32>
    %c0_114 = arith.constant 0 : index
    %c0_115 = arith.constant 0 : index
    %210 = vector.load %arg10[%c0_114, %c0_115] : memref<8x128xf32, #tpu.memory_space<vmem>>, vector<8x128xf32>
    tpu.vector_store %arg10[%c0_114, %c0_115], %207 {strides = array<i32>} : memref<8x128xf32, #tpu.memory_space<vmem>>, vector<8x128xf32>,
    %c0_116 = arith.constant 0 : index
    %c0_117 = arith.constant 0 : index
    %211 = vector.load %arg9[%c0_116, %c0_117] : memref<8x128xf32, #tpu.memory_space<vmem>>, vector<8x128xf32>
    tpu.vector_store %arg9[%c0_116, %c0_117], %209 {strides = array<i32>} : memref<8x128xf32, #tpu.memory_space<vmem>>, vector<8x128xf32>,
    %212 = arith.index_cast %186 : i32 to index
    %c0_118 = arith.constant 0 : index
    %213 = vector.load %arg6[%212, %c0_118] : memref<64x128xf32, #tpu.memory_space<vmem>>, vector<8x128xf32>
    tpu.vector_store %arg6[%212, %c0_118], %209 {strides = array<i32>} : memref<64x128xf32, #tpu.memory_space<vmem>>, vector<8x128xf32>,
    %c7_i32 = arith.constant 7 : i32
    %c8_i32_119 = arith.constant 8 : i32
    %214 = arith.muli %c7_i32, %c8_i32_119 : i32
    %215 = tpu.assume_multiple %214, 8 : i32
    %216 = arith.index_cast %215 : i32 to index
    %c0_120 = arith.constant 0 : index
    %217 = vector.load %arg8[%216, %c0_120] : memref<64x512xf32, #tpu.memory_space<vmem>>, vector<8x512xf32>
    %c0_121 = arith.constant 0 : index
    %c0_122 = arith.constant 0 : index
    %218 = vector.load %arg9[%c0_121, %c0_122] : memref<8x128xf32, #tpu.memory_space<vmem>>, vector<8x128xf32>
    %c0_123 = arith.constant 0 : index
    %c0_124 = arith.constant 0 : index
    %219 = vector.load %arg5[%c0_123, %c0_124] : memref<128x512xf32, #tpu.memory_space<vmem>>, vector<128x512xf32>
    %cst_125 = arith.constant dense<0.000000e+00> : vector<8x512xf32>
    %220 = tpu.matmul %218, %219, %cst_125 {dimension_numbers = #tpu.dot_dimension_numbers<[1], [0], [0], [1], [0, 0, 1, 1], [], []>} : vector<8x128xf32>, vector<128x512xf32>, vector<8x512xf32> -> vector<8x512xf32>
    %221 = arith.addf %217, %220 : vector<8x512xf32>
    %222 = vector.extract_strided_slice %221 {offsets = [0, 0], sizes = [8, 384], strides = [1, 1]} : vector<8x512xf32> to vector<8x384xf32>
    %223 = arith.negf %222 : vector<8x384xf32>
    %224 = math.exp %223 : vector<8x384xf32>
    %cst_126 = arith.constant 1.000000e+00 : f32
    %225 = vector.broadcast %cst_126 : f32 to vector<8x384xf32>
    %226 = arith.addf %225, %224 : vector<8x384xf32>
    %227 = arith.divf %225, %226 : vector<8x384xf32>
    %228 = vector.extract_strided_slice %221 {offsets = [0, 384], sizes = [8, 128], strides = [1, 1]} : vector<8x512xf32> to vector<8x128xf32>
    %229 = math.tanh %228 : vector<8x128xf32>
    %230 = vector.extract_strided_slice %227 {offsets = [0, 0], sizes = [8, 128], strides = [1, 1]} : vector<8x384xf32> to vector<8x128xf32>
    %231 = vector.extract_strided_slice %227 {offsets = [0, 128], sizes = [8, 128], strides = [1, 1]} : vector<8x384xf32> to vector<8x128xf32>
    %232 = vector.extract_strided_slice %227 {offsets = [0, 256], sizes = [8, 128], strides = [1, 1]} : vector<8x384xf32> to vector<8x128xf32>
    %c0_127 = arith.constant 0 : index
    %c0_128 = arith.constant 0 : index
    %233 = vector.load %arg10[%c0_127, %c0_128] : memref<8x128xf32, #tpu.memory_space<vmem>>, vector<8x128xf32>
    %234 = arith.mulf %231, %233 : vector<8x128xf32>
    %235 = arith.mulf %230, %229 : vector<8x128xf32>
    %236 = arith.addf %234, %235 : vector<8x128xf32>
    %237 = math.tanh %236 : vector<8x128xf32>
    %238 = arith.mulf %232, %237 : vector<8x128xf32>
    %c0_129 = arith.constant 0 : index
    %c0_130 = arith.constant 0 : index
    %239 = vector.load %arg10[%c0_129, %c0_130] : memref<8x128xf32, #tpu.memory_space<vmem>>, vector<8x128xf32>
    tpu.vector_store %arg10[%c0_129, %c0_130], %236 {strides = array<i32>} : memref<8x128xf32, #tpu.memory_space<vmem>>, vector<8x128xf32>,
    %c0_131 = arith.constant 0 : index
    %c0_132 = arith.constant 0 : index
    %240 = vector.load %arg9[%c0_131, %c0_132] : memref<8x128xf32, #tpu.memory_space<vmem>>, vector<8x128xf32>
    tpu.vector_store %arg9[%c0_131, %c0_132], %238 {strides = array<i32>} : memref<8x128xf32, #tpu.memory_space<vmem>>, vector<8x128xf32>,
    %241 = arith.index_cast %215 : i32 to index
    %c0_133 = arith.constant 0 : index
    %242 = vector.load %arg6[%241, %c0_133] : memref<64x128xf32, #tpu.memory_space<vmem>>, vector<8x128xf32>
    tpu.vector_store %arg6[%241, %c0_133], %238 {strides = array<i32>} : memref<64x128xf32, #tpu.memory_space<vmem>>, vector<8x128xf32>,
    %c8_i32_134 = arith.constant 8 : i32
    %c0_135 = arith.constant 0 : index
    %c0_136 = arith.constant 0 : index
    %243 = vector.load %arg10[%c0_135, %c0_136] : memref<8x128xf32, #tpu.memory_space<vmem>>, vector<8x128xf32>
    %c0_137 = arith.constant 0 : index
    %c0_138 = arith.constant 0 : index
    %244 = vector.load %arg7[%c0_137, %c0_138] : memref<8x128xf32, #tpu.memory_space<vmem>>, vector<8x128xf32>
    tpu.vector_store %arg7[%c0_137, %c0_138], %243 {strides = array<i32>} : memref<8x128xf32, #tpu.memory_space<vmem>>, vector<8x128xf32>,
    return
  }
}

</mosaic_0001>

<bundles_post_ra>
// kernel: tpu_custom_call.1
= control target key start
LH: loop header
LB: loop body
LE: loop exit
PB: predicated region body
PF: predicated region fallthrough
CT: control target
= control target key end

     0   :  { %13 = vsyncpa [#allocation6], 0  ;;  %s3838_s0 = inlined_call_operand.vmem [shape: f32[64,16], index: 0, kind: input, shape index: {}]   ;;  %s3839_s1 = inlined_call_operand.vmem [shape: f32[8,128], index: 1, kind: input, shape index: {}]   ;;  %s3840_s2 = inlined_call_operand.vmem [shape: f32[8,128], index: 2, kind: input, shape index: {}]   ;;  %s3841_s3 = inlined_call_operand.vmem [shape: f32[16,512], index: 3, kind: input, shape index: {}]   ;;  %s3842_s4 = inlined_call_operand.vmem [shape: f32[1,512], index: 4, kind: input, shape index: {}]   ;;  %s3843_s5 = inlined_call_operand.hbm [shape: f32[128,512], index: 5, kind: input, shape index: {}]   ;;  %s3844_s6 = inlined_call_operand.hbm [shape: f32[64,128], index: 6, kind: output, shape index: {0}]   ;;  %s3845_s7 = inlined_call_operand.hbm [shape: f32[8,128], index: 7, kind: output, shape index: {1}]  }
   0x1   :  { %14 = vsyncpa [#allocation7], 0 }
   0x2   :  { %15 = vsyncpa [#allocation10], 0  ;;  %s3213_s24 = smov [#allocation5]   ;;  %s3141_s28 = scalar_lea.hbm %s3843_s5, 8192 }
   0x3   :  { %s31_s25 = sshll.u32 %s3213_s24, 4  ;;  %p3142_p0 = scmp.ne.s32.totalorder %s3843_s5, %s3141_s28  ;;  %s32_s25 = int_to_ptr.vmem [resolvable:$true] %s31_s25 }
   0x4   :  { %p3145_p1 = scmp.lt.u32.totalorder %s3141_s28, %s3843_s5 }
   0x6   :  { %p3147_p2 = pnand %p3145_p1, %p3142_p0 }
   0x8   :  { %3150 = shalt.err (!%p3147_p2)
}
   0x9   :  { %s3151_s10 = scalar_lea.vmem %s32_s25, 8192  ;;  %p3156_p4 = scmp.lt.s32.totalorder %s32_s25, %s32_s25 }
   0xa   :  { %p3152_p3 = scmp.ne.s32.totalorder %s32_s25, %s3151_s10  ;;  %p3157_p5 = scmp.lt.s32.totalorder %s3151_s10, %s3151_s10 }
   0xc   :  { %p3158_p6 = por %p3157_p5, %p3156_p4 }
   0xe   :  { %p3159_p7 = pnand %p3158_p6, %p3152_p3 }
  0x10   :  { %3162 = shalt.err (!%p3159_p7)
}
  0x11   :  { %s3214_s11 = smov 512   ;;  %s3215_s12 = smov 32  }
  0x12   :  { %37 = dma.hbm_to_vmem [thread:$0]  %s3843_s5, 8192, %s32_s25, [#allocation6], %s3214_s11, %s3214_s11, %s3215_s12  }
  0x13   :  { %3207 = dma.done.wait [#allocation6], 8192  }
  0x14   :  { %3208 = vsyncadd [#allocation6], 4294959104  ;;  %v3216_v0 = vmov 0.0   ;;  %v50_v1 = vld [vmem:[%s3841_s3 + $0x8] sm:$0xff]  ;;  %v52_v3 = vld [vmem:[%s3841_s3 + $0x18] sm:$0xff]  ;;  %vm79_vm0 = vcmask 130048  }
  0x15   :  { %168 = vmatprep.mubr.f32.mxu0 %v3216_v0  ;;  %281 = vmatprep.mubr.f32.mxu1 %v3216_v0  ;;  %v54_v2 = vld [vmem:[%s3841_s3 + $0x28] sm:$0xff]  ;;  %v56_v5 = vld [vmem:[%s3841_s3 + $0x38] sm:$0xff]  ;;  %v49_v6 = vld [vmem:[%s3841_s3] sm:$0xff] }
  0x16   :  { %v2421_v4 = vpack.c.bf16 %v54_v2, %v50_v1  ;;  %v53_v7 = vld [vmem:[%s3841_s3 + $0x20] sm:$0xff]  ;;  %v2425_v8 = vpack.c.bf16 %v56_v5, %v52_v3  ;;  %v51_v10 = vld [vmem:[%s3841_s3 + $0x10] sm:$0xff]  ;;  %v375_v14 = vld [vmem:[#allocation5 + $0x8] sm:$0xff] }
  0x17   :  { %v2423_v9 = vpack.c.bf16 %v53_v7, %v49_v6  ;;  %v55_v11 = vld [vmem:[%s3841_s3 + $0x30] sm:$0xff]  ;;  %v41_v12 = vld [vmem:[%s3838_s0] sm:$0xff]  ;;  %v379_v15 = vld [vmem:[#allocation5 + $0x28] sm:$0xff] }
  0x18   :  { %2422 = vmatprep.subr.bf16.mxu0 %v2421_v4  ;;  %v2427_v13 = vpack.c.bf16 %v55_v11, %v51_v10  ;;  %v377_v16 = vld [vmem:[#allocation5 + $0x18] sm:$0xff]  ;;  %2426 = vmatprep.subr.bf16.mxu1 %v2425_v8  ;;  %v3302_v17 = vpack.c.bf16 %v379_v15, %v375_v14  ;;  %v374_v19 = vld [vmem:[#allocation5] sm:$0xff]  ;;  %v376_v23 = vld [vmem:[#allocation5 + $0x10] sm:$0xff] }
  0x19   :  { %2424 = vmatpush1.bf16.msra.mxu0 %v2423_v9  ;;  %v381_v18 = vld [vmem:[#allocation5 + $0x38] sm:$0xff]  ;;  %v378_v20 = vld [vmem:[#allocation5 + $0x20] sm:$0xff]  ;;  %v380_v24 = vld [vmem:[#allocation5 + $0x30] sm:$0xff] }
  0x1a   :  { %2428 = vmatpush1.bf16.msra.mxu1 %v2427_v13  ;;  %v3304_v21 = vpack.c.bf16 %v381_v18, %v377_v16  ;;  %v3306_v22 = vpack.c.bf16 %v378_v20, %v374_v19  ;;  %2430 = vmatprep.subr.bf16.mxu0 %v3302_v17  ;;  %v3309_v25 = vpack.c.bf16 %v380_v24, %v376_v23  ;;  %v383_v26 = vld [vmem:[#allocation5 + $0x48] sm:$0xff]  ;;  %v385_v28 = vld [vmem:[#allocation5 + $0x58] sm:$0xff]  ;;  %v382_v31 = vld [vmem:[#allocation5 + $0x40] sm:$0xff] }
  0x1b   :  { %v387_v27 = vld [vmem:[#allocation5 + $0x68] sm:$0xff]  ;;  %v389_v30 = vld [vmem:[#allocation5 + $0x78] sm:$0xff]  ;;  %v386_v32 = vld [vmem:[#allocation5 + $0x60] sm:$0xff] }
  0x1c   :  { %2381 = vmatmul.mubr.msk.f32.vlgmr.msra.gmra.mrb[0].mxu0 %vm79_vm0, %v41_v12  ;;  %2462 = vmatprep.subr.bf16.mxu1 %v3304_v21  ;;  %v3313_v29 = vpack.c.bf16 %v387_v27, %v383_v26  ;;  %v42_v33 = vld [vmem:[%s3838_s0 + $0x8] sm:$0xff]  ;;  %v3320_v34 = vpack.c.bf16 %v389_v30, %v385_v28  ;;  %v3322_v35 = vpack.c.bf16 %v386_v32, %v382_v31  ;;  %v384_v36 = vld [vmem:[#allocation5 + $0x50] sm:$0xff]  ;;  %v393_v41 = vld [vmem:[#allocation5 + $0x98] sm:$0xff] }
  0x1d   :  { %2389 = vmatmul.mubr.msk.f32.vlgmr.msra.gmra.mrb[0].mxu1 %vm79_vm0, %v41_v12  ;;  %2432 = vmatpush1.bf16.msra.mxu0 %v3306_v22  ;;  %v388_v37 = vld [vmem:[#allocation5 + $0x70] sm:$0xff]  ;;  %v391_v39 = vld [vmem:[#allocation5 + $0x88] sm:$0xff]  ;;  %v397_v43 = vld [vmem:[#allocation5 + $0xb8] sm:$0xff] }
  0x1e   :  { %2464 = vmatpush1.bf16.msra.mxu1 %v3309_v25  ;;  %174 = vmatprep.mubr.f32.mxu0 %v3216_v0  ;;  %v3326_v38 = vpack.c.bf16 %v388_v37, %v384_v36  ;;  %v395_v40 = vld [vmem:[#allocation5 + $0xa8] sm:$0xff]  ;;  %v390_v44 = vld [vmem:[#allocation5 + $0x80] sm:$0xff]  ;;  %v43_v46 = vld [vmem:[%s3838_s0 + $0x10] sm:$0xff]  ;;  %v3337_v47 = vpack.c.bf16 %v397_v43, %v393_v41 }
  0x1f   :  { %287 = vmatprep.mubr.f32.mxu1 %v3216_v0  ;;  %2434 = vmatprep.subr.bf16.mxu0 %v3313_v29  ;;  %v3330_v42 = vpack.c.bf16 %v395_v40, %v391_v39  ;;  %v394_v45 = vld [vmem:[#allocation5 + $0xa0] sm:$0xff]  ;;  %v392_v48 = vld [vmem:[#allocation5 + $0x90] sm:$0xff]  ;;  %v399_v51 = vld [vmem:[#allocation5 + $0xc8] sm:$0xff] }
  0x20   :  { %2382 = vmatmul.mubr.msk.f32.gmra.mrb[2].mxu0 %vm79_vm0, %v42_v33  ;;  %2466 = vmatprep.subr.bf16.mxu1 %v3320_v34  ;;  %v396_v49 = vld [vmem:[#allocation5 + $0xb0] sm:$0xff]  ;;  %v3341_v50 = vpack.c.bf16 %v394_v45, %v390_v44  ;;  %v403_v52 = vld [vmem:[#allocation5 + $0xe8] sm:$0xff]  ;;  %v401_v53 = vld [vmem:[#allocation5 + $0xd8] sm:$0xff] }
  0x21   :  { %2390 = vmatmul.mubr.msk.f32.gmra.mrb[2].mxu1 %vm79_vm0, %v42_v33  ;;  %2436 = vmatpush1.bf16.msra.mxu0 %v3322_v35  ;;  %v3345_v54 = vpack.c.bf16 %v396_v49, %v392_v48  ;;  %v405_v55 = vld [vmem:[#allocation5 + $0xf8] sm:$0xff]  ;;  %v398_v56 = vld [vmem:[#allocation5 + $0xc0] sm:$0xff]  ;;  %v3349_v58 = vpack.c.bf16 %v403_v52, %v399_v51  ;;  %v400_v59 = vld [vmem:[#allocation5 + $0xd0] sm:$0xff] }
  0x22   :  { %2468 = vmatpush1.bf16.msra.mxu1 %v3326_v38  ;;  %180 = vmatprep.mubr.f32.mxu0 %v3216_v0  ;;  %v402_v57 = vld [vmem:[#allocation5 + $0xe0] sm:$0xff]  ;;  %v404_v60 = vld [vmem:[#allocation5 + $0xf0] sm:$0xff]  ;;  %v3353_v61 = vpack.c.bf16 %v405_v55, %v401_v53  ;;  %v407_v62 = vld [vmem:[#allocation5 + $0x108] sm:$0xff] }
  0x23   :  { %293 = vmatprep.mubr.f32.mxu1 %v3216_v0  ;;  %2438 = vmatprep.subr.bf16.mxu0 %v3330_v42  ;;  %v411_v63 = vld [vmem:[#allocation5 + $0x128] sm:$0xff]  ;;  %v44_v1 = vld [vmem:[%s3838_s0 + $0x18] sm:$0xff]  ;;  %v3360_v2 = vpack.c.bf16 %v402_v57, %v398_v56  ;;  %v3364_v5 = vpack.c.bf16 %v404_v60, %v400_v59  ;;  %v406_v6 = vld [vmem:[#allocation5 + $0x100] sm:$0xff] }
  0x24   :  { %2383 = vmatmul.mubr.msk.f32.gmra.mrb[4].mxu0 %vm79_vm0, %v43_v46  ;;  %2470 = vmatprep.subr.bf16.mxu1 %v3337_v47  ;;  %v409_v3 = vld [vmem:[#allocation5 + $0x118] sm:$0xff]  ;;  %v410_v7 = vld [vmem:[#allocation5 + $0x120] sm:$0xff]  ;;  %v3368_v8 = vpack.c.bf16 %v411_v63, %v407_v62  ;;  %v408_v9 = vld [vmem:[#allocation5 + $0x110] sm:$0xff] }
  0x25   :  { %2391 = vmatmul.mubr.msk.f32.gmra.mrb[4].mxu1 %vm79_vm0, %v43_v46  ;;  %2440 = vmatpush1.bf16.msra.mxu0 %v3341_v50  ;;  %v413_v4 = vld [vmem:[#allocation5 + $0x138] sm:$0xff]  ;;  %v412_v10 = vld [vmem:[#allocation5 + $0x130] sm:$0xff]  ;;  %v415_v12 = vld [vmem:[#allocation5 + $0x148] sm:$0xff]  ;;  %v3379_v15 = vpack.c.bf16 %v410_v7, %v406_v6 }
  0x26   :  { %2472 = vmatpush1.bf16.msra.mxu1 %v3345_v54  ;;  %186 = vmatprep.mubr.f32.mxu0 %v3216_v0  ;;  %v3372_v11 = vpack.c.bf16 %v413_v4, %v409_v3  ;;  %v419_v13 = vld [vmem:[#allocation5 + $0x168] sm:$0xff]  ;;  %v45_v14 = vld [vmem:[%s3838_s0 + $0x20] sm:$0xff]  ;;  %v417_v16 = vld [vmem:[#allocation5 + $0x158] sm:$0xff]  ;;  %v3383_v19 = vpack.c.bf16 %v412_v10, %v408_v9  ;;  %v59_v9 = vlaneseq }
  0x27   :  { %299 = vmatprep.mubr.f32.mxu1 %v3216_v0  ;;  %2442 = vmatprep.subr.bf16.mxu0 %v3349_v58  ;;  %v421_v18 = vld [vmem:[#allocation5 + $0x178] sm:$0xff]  ;;  %v414_v20 = vld [vmem:[#allocation5 + $0x140] sm:$0xff]  ;;  %v3387_v24 = vpack.c.bf16 %v419_v13, %v415_v12  ;;  %v416_v26 = vld [vmem:[#allocation5 + $0x150] sm:$0xff] }
  0x28   :  { %2384 = vmatmul.mubr.msk.f32.gmra.mrb[6].mxu0 %vm79_vm0, %v44_v1  ;;  %2474 = vmatprep.subr.bf16.mxu1 %v3353_v61  ;;  %v418_v23 = vld [vmem:[#allocation5 + $0x160] sm:$0xff]  ;;  %v420_v27 = vld [vmem:[#allocation5 + $0x170] sm:$0xff]  ;;  %v3391_v28 = vpack.c.bf16 %v421_v18, %v417_v16  ;;  %v423_v30 = vld [vmem:[#allocation5 + $0x188] sm:$0xff]  ;;  %v60_v10 = vshrl.u32 %v59_v9, 7 }
  0x29   :  { %2392 = vmatmul.mubr.msk.f32.gmra.mrb[6].mxu1 %vm79_vm0, %v44_v1  ;;  %2444 = vmatpush1.bf16.msra.mxu0 %v3360_v2  ;;  %v427_v31 = vld [vmem:[#allocation5 + $0x1a8] sm:$0xff]  ;;  %v3398_v33 = vpack.c.bf16 %v418_v23, %v414_v20  ;;  %v425_v36 = vld [vmem:[#allocation5 + $0x198] sm:$0xff]  ;;  %v3402_v39 = vpack.c.bf16 %v420_v27, %v416_v26  ;;  %v422_v40 = vld [vmem:[#allocation5 + $0x180] sm:$0xff] }
  0x2a   :  { %2476 = vmatpush1.bf16.msra.mxu1 %v3364_v5  ;;  %192 = vmatprep.mubr.f32.mxu0 %v3216_v0  ;;  %v46_v32 = vld [vmem:[%s3838_s0 + $0x28] sm:$0xff]  ;;  %v429_v37 = vld [vmem:[#allocation5 + $0x1b8] sm:$0xff]  ;;  %v426_v41 = vld [vmem:[#allocation5 + $0x1a0] sm:$0xff]  ;;  %v3406_v43 = vpack.c.bf16 %v427_v31, %v423_v30  ;;  %v61_v12 = vsub.s32 0, %v60_v10  ;;  %v69_v23 = vsub.s32 2, %v60_v10 }
  0x2b   :  { %305 = vmatprep.mubr.f32.mxu1 %v3216_v0  ;;  %2446 = vmatprep.subr.bf16.mxu0 %v3368_v8  ;;  %v424_v44 = vld [vmem:[#allocation5 + $0x190] sm:$0xff]  ;;  %v3410_v46 = vpack.c.bf16 %v429_v37, %v425_v36  ;;  %v431_v48 = vld [vmem:[#allocation5 + $0x1c8] sm:$0xff]  ;;  %v3417_v52 = vpack.c.bf16 %v426_v41, %v422_v40  ;;  %v433_v53 = vld [vmem:[#allocation5 + $0x1d8] sm:$0xff]  ;;  %v73_v37 = vsub.s32 3, %v60_v10 }
  0x2c   :  { %2385 = vmatmul.mubr.msk.f32.gmra.mrb[8].mxu0 %vm79_vm0, %v45_v14  ;;  %2478 = vmatprep.subr.bf16.mxu1 %v3372_v11  ;;  %v428_v45 = vld [vmem:[#allocation5 + $0x1b0] sm:$0xff]  ;;  %v435_v49 = vld [vmem:[#allocation5 + $0x1e8] sm:$0xff]  ;;  %v437_v55 = vld [vmem:[#allocation5 + $0x1f8] sm:$0xff] }
  0x2d   :  { %2393 = vmatmul.mubr.msk.f32.gmra.mrb[8].mxu1 %vm79_vm0, %v45_v14  ;;  %2448 = vmatpush1.bf16.msra.mxu0 %v3379_v15  ;;  %v47_v51 = vld [vmem:[%s3838_s0 + $0x30] sm:$0xff]  ;;  %v3421_v56 = vpack.c.bf16 %v428_v45, %v424_v44  ;;  %v430_v57 = vld [vmem:[#allocation5 + $0x1c0] sm:$0xff]  ;;  %v3425_v60 = vpack.c.bf16 %v435_v49, %v431_v48  ;;  %v3429_v1 = vpack.c.bf16 %v437_v55, %v433_v53  ;;  %v48_v3 = vld [vmem:[%s3838_s0 + $0x38] sm:$0xff]  ;;  %v65_v14 = vsub.s32 1, %v60_v10 }
  0x2e   :  { %2480 = vmatpush1.bf16.msra.mxu1 %v3383_v19  ;;  %198 = vmatprep.mubr.f32.mxu0 %v3216_v0  ;;  %v434_v59 = vld [vmem:[#allocation5 + $0x1e0] sm:$0xff]  ;;  %v432_v62 = vld [vmem:[#allocation5 + $0x1d0] sm:$0xff] }
  0x2f   :  { %311 = vmatprep.mubr.f32.mxu1 %v3216_v0  ;;  %2450 = vmatprep.subr.bf16.mxu0 %v3387_v24  ;;  %v436_v63 = vld [vmem:[#allocation5 + $0x1f0] sm:$0xff]  ;;  %v3436_v4 = vpack.c.bf16 %v434_v59, %v430_v57  ;;  %v362_v7 = vld [vmem:[%s3839_s1] sm:$0xff] }
  0x30   :  { %2386 = vmatmul.mubr.msk.f32.gmra.mrb[10].mxu0 %vm79_vm0, %v46_v32  ;;  %2482 = vmatprep.subr.bf16.mxu1 %v3391_v28  ;;  %v3440_v6 = vpack.c.bf16 %v436_v63, %v432_v62  ;;  %v57_v13 = vld [vmem:[%s3842_s4] sm:$0xf] }
  0x31   :  { %2394 = vmatmul.mubr.msk.f32.gmra.mrb[10].mxu1 %vm79_vm0, %v46_v32  ;;  %2452 = vmatpush1.bf16.msra.mxu0 %v3398_v33  ;;  %v3493_v16 = vrot.slane %v57_v13, %v61_v12  ;;  %v3495_v18 = vrot.slane %v57_v13, %v65_v14  ;;  %v3499_v32 = vrot.slane %v57_v13, %v69_v23  ;;  %v364_v62 = vld [vmem:[%s3840_s2] sm:$0xff]  ;;  %s3217_s2 = smov [#allocation9]  }
  0x32   :  { %2484 = vmatpush1.bf16.msra.mxu1 %v3402_v39  ;;  %204 = vmatprep.mubr.f32.mxu0 %v3216_v0  ;;  %v3502_v41 = vrot.slane %v57_v13, %v73_v37  ;;  %s2361_s24 = sshll.u32 %s3217_s2, 4  ;;  %s2362_s24 = int_to_ptr.vmem [resolvable:$true] %s2361_s24 }
  0x33   :  { %317 = vmatprep.mubr.f32.mxu1 %v3216_v0  ;;  %2454 = vmatprep.subr.bf16.mxu0 %v3406_v43  ;;  %s3163_s25 = scalar_lea.vmem %s2362_s24, 128  ;;  %p3168_p9 = scmp.lt.s32.totalorder %s2362_s24, %s2362_s24 }
  0x34   :  { %2387 = vmatmul.mubr.msk.f32.gmra.mrb[12].mxu0 %vm79_vm0, %v47_v51  ;;  %2486 = vmatprep.subr.bf16.mxu1 %v3410_v46  ;;  %p3164_p8 = scmp.ne.s32.totalorder %s2362_s24, %s3163_s25  ;;  %p3169_p10 = scmp.lt.s32.totalorder %s3163_s25, %s3163_s25 }
  0x35   :  { %2395 = vmatmul.mubr.msk.f32.gmra.mrb[12].mxu1 %vm79_vm0, %v47_v51  ;;  %2456 = vmatpush1.bf16.msra.mxu0 %v3417_v52 }
  0x36   :  { %2488 = vmatpush1.bf16.msra.mxu1 %v3421_v56  ;;  %210 = vmatprep.mubr.f32.mxu0 %v3216_v0  ;;  %p3170_p11 = por %p3169_p10, %p3168_p9 }
  0x37   :  { %323 = vmatprep.mubr.f32.mxu1 %v3216_v0  ;;  %2458 = vmatprep.subr.bf16.mxu0 %v3425_v60 }
  0x38   :  { %2388 = vmatmul.mubr.msk.f32.gmra.mrb[14].mxu0 %vm79_vm0, %v48_v3  ;;  %2490 = vmatprep.subr.bf16.mxu1 %v3429_v1  ;;  %p3171_p12 = pnand %p3170_p11, %p3164_p8 }
  0x39   :  { %2396 = vmatmul.mubr.msk.f32.gmra.mrb[14].mxu1 %vm79_vm0, %v48_v3  ;;  %2460 = vmatpush1.bf16.msra.mxu0 %v3436_v4 }
  0x3a   :  { %2492 = vmatpush1.bf16.msra.mxu1 %v3440_v6  ;;  %502 = vmatprep.mubr.f32.mxu0 %v3216_v0 }
  0x3b   :  { %573 = vmatprep.mubr.f32.mxu1 %v3216_v0  ;;  %2494 = vmatprep.subr.bf16.mxu0 %v3302_v17 }
  0x3c   :  { %503 = vmatmul.mubr.f32.vlgmr.msra.gmra.mrb[0].mxu0 %v362_v7  ;;  %2526 = vmatprep.subr.bf16.mxu1 %v3304_v21 }
  0x3d   :  { %574 = vmatmul.mubr.f32.vlgmr.msra.gmra.mrb[0].mxu1 %v362_v7  ;;  %2496 = vmatpush1.bf16.msra.mxu0 %v3306_v22 }
  0x3e   :  { %2528 = vmatpush1.bf16.msra.mxu1 %v3309_v25  ;;  %2498 = vmatprep.subr.bf16.mxu0 %v3313_v29 }
  0x3f   :  { %2530 = vmatprep.subr.bf16.mxu1 %v3320_v34  ;;  %748 = vmatprep.mubr.f32.mxu0 %v3216_v0 }
  0x40   :  { %819 = vmatprep.mubr.f32.mxu1 %v3216_v0 }
  0x41   :  { %2500 = vmatpush1.bf16.msra.mxu0 %v3322_v35 }
  0x42   :  { %2532 = vmatpush1.bf16.msra.mxu1 %v3326_v38  ;;  %2502 = vmatprep.subr.bf16.mxu0 %v3330_v42 }
  0x43   :  { %2534 = vmatprep.subr.bf16.mxu1 %v3337_v47 }
  0x45   :  { %2504 = vmatpush1.bf16.msra.mxu0 %v3341_v50 }
  0x46   :  { %2536 = vmatpush1.bf16.msra.mxu1 %v3345_v54  ;;  %2506 = vmatprep.subr.bf16.mxu0 %v3349_v58 }
  0x47   :  { %2538 = vmatprep.subr.bf16.mxu1 %v3353_v61 }
  0x49   :  { %2508 = vmatpush1.bf16.msra.mxu0 %v3360_v2 }
  0x4a   :  { %2540 = vmatpush1.bf16.msra.mxu1 %v3364_v5  ;;  %2510 = vmatprep.subr.bf16.mxu0 %v3368_v8 }
  0x4b   :  { %2542 = vmatprep.subr.bf16.mxu1 %v3372_v11 }
  0x4d   :  { %2512 = vmatpush1.bf16.msra.mxu0 %v3379_v15 }
  0x4e   :  { %2544 = vmatpush1.bf16.msra.mxu1 %v3383_v19  ;;  %2514 = vmatprep.subr.bf16.mxu0 %v3387_v24 }
  0x4f   :  { %2546 = vmatprep.subr.bf16.mxu1 %v3391_v28 }
  0x51   :  { %2516 = vmatpush1.bf16.msra.mxu0 %v3398_v33 }
  0x52   :  { %2548 = vmatpush1.bf16.msra.mxu1 %v3402_v39  ;;  %2518 = vmatprep.subr.bf16.mxu0 %v3406_v43 }
  0x53   :  { %2550 = vmatprep.subr.bf16.mxu1 %v3410_v46 }
  0x55   :  { %2520 = vmatpush1.bf16.msra.mxu0 %v3417_v52 }
  0x56   :  { %2552 = vmatpush1.bf16.msra.mxu1 %v3421_v56  ;;  %2522 = vmatprep.subr.bf16.mxu0 %v3425_v60 }
  0x57   :  { %2554 = vmatprep.subr.bf16.mxu1 %v3429_v1 }
  0x59   :  { %2524 = vmatpush1.bf16.msra.mxu0 %v3436_v4 }
  0x5a   :  { %2556 = vmatpush1.bf16.msra.mxu1 %v3440_v6  ;;  %2558 = vmatprep.subr.bf16.mxu0 %v3302_v17 }
  0x5b   :  { %2590 = vmatprep.subr.bf16.mxu1 %v3304_v21 }
 0x10f   :  { %v504_v20 = vpop.f32.mrb[0].mxu0 }
 0x110   :  { %v2941_v26 = vadd.f32 %v504_v20, %v3493_v16  ;;  %v575_v27 = vpop.f32.mrb[0].mxu1  ;;  %v506_v17 = vpop.f32.mrb[1].mxu0 }
 0x111   :  { %v2942_v21 = vadd.f32 %v506_v17, %v3495_v18  ;;  %v577_v30 = vpop.f32.mrb[1].mxu1  ;;  %v2957_v40 = vadd.f32 %v575_v27, %v3499_v32 }
 0x112   :  { %v2397_v31 = vmul.f32 -1.442695, %v2941_v26  ;;  %v2958_v45 = vadd.f32 %v577_v30, %v3502_v41 }
 0x113   :  { %v2398_v36 = vmul.f32 -1.442695, %v2942_v21  ;;  %v2399_v44 = vmul.f32 -1.442695, %v2957_v40 }
 0x114   :  { %3013 = vpow2.f32 %v2397_v31 }
 0x115   :  { %3015 = vpow2.f32 %v2398_v36 }
 0x116   :  { %3017 = vpow2.f32 %v2399_v44 }
 0x117   :  { %3019 = vtanh.f32 %v2958_v45 }
 0x11e   :  { %v3014_v48 = vpop.eup %3013 }
 0x11f   :  { %v593_v49 = vadd.f32 1.0, %v3014_v48  ;;  %v3016_v51 = vpop.eup %3015 }
 0x120   :  { %v594_v53 = vadd.f32 1.0, %v3016_v51  ;;  %v3018_v55 = vpop.eup %3017 }
 0x121   :  { %3021 = vrcp.f32 %v593_v49  ;;  %v3020_v57 = vpop.eup %3019  ;;  %v595_v7 = vadd.f32 1.0, %v3018_v55  ;;  %v1119_v55 = vld [vmem:[#allocation5 + $0x28] sm:$0xff] }
 0x122   :  { %3023 = vrcp.f32 %v594_v53  ;;  %v1115_v53 = vld [vmem:[#allocation5 + $0x8] sm:$0xff] }
 0x123   :  { %3025 = vrcp.f32 %v595_v7 }
 0x12b   :  { %v3022_v59 = vpop.eup %3021 }
 0x12c   :  { %v605_v63 = vmul.f32 %v3022_v59, %v3020_v57  ;;  %v3024_v3 = vpop.eup %3023  ;;  %v1117_v57 = vld [vmem:[#allocation5 + $0x18] sm:$0xff]  ;;  %v3553_v59 = vpack.c.bf16 %v1119_v55, %v1115_v53 }
 0x12d   :  { %v604_v9 = vmul.f32 %v3024_v3, %v364_v62  ;;  %v3026_v12 = vpop.eup %3025  ;;  %v1121_v62 = vld [vmem:[#allocation5 + $0x38] sm:$0xff]  ;;  %v1118_v3 = vld [vmem:[#allocation5 + $0x20] sm:$0xff] }
 0x12e   :  { %v3555_v7 = vpack.c.bf16 %v1121_v62, %v1117_v57 }
 0x12f   :  { %v3508_v10 = vadd.f32 %v605_v63, %v604_v9  ;;  %v1114_v63 = vld [vmem:[#allocation5] sm:$0xff] }
 0x130   :  { %v3557_v9 = vpack.c.bf16 %v1118_v3, %v1114_v63  ;;  %v1390_v63 = vld [vmem:[#allocation5 + $0xe8] sm:$0xff]  ;;  %v1388_v3 = vld [vmem:[#allocation5 + $0xd8] sm:$0xff] }
 0x131   :  { %3027 = vtanh.f32 %v3508_v10 }
 0x13b   :  { %v3028_v13 = vpop.eup %3027 }
 0x13c   :  { %v608_v14 = vmul.f32 %v3028_v13, %v3026_v12  ;;  %v1120_v12 = vld [vmem:[#allocation5 + $0x30] sm:$0xff] }
 0x13e   :  { %611 = vst [vmem:[#allocation8] sm:$0xff] %v608_v14  ;;  %749 = vmatmul.mubr.f32.vlgmr.msra.gmra.mrb[2].mxu0 %v608_v14  ;;  %820 = vmatmul.mubr.f32.vlgmr.msra.gmra.mrb[2].mxu1 %v608_v14  ;;  %v1123_v14 = vld [vmem:[#allocation5 + $0x48] sm:$0xff] }
 0x13f   :  { %2560 = vmatpush1.bf16.msra.mxu0 %v3306_v22  ;;  %2592 = vmatpush1.bf16.msra.mxu1 %v3309_v25 }
 0x140   :  { %2562 = vmatprep.subr.bf16.mxu0 %v3313_v29  ;;  %2594 = vmatprep.subr.bf16.mxu1 %v3320_v34 }
 0x141   :  { %995 = vmatprep.mubr.f32.mxu0 %v3216_v0  ;;  %1066 = vmatprep.mubr.f32.mxu1 %v3216_v0 }
 0x143   :  { %2564 = vmatpush1.bf16.msra.mxu0 %v3322_v35  ;;  %2596 = vmatpush1.bf16.msra.mxu1 %v3326_v38 }
 0x144   :  { %2566 = vmatprep.subr.bf16.mxu0 %v3330_v42  ;;  %2598 = vmatprep.subr.bf16.mxu1 %v3337_v47 }
 0x147   :  { %2568 = vmatpush1.bf16.msra.mxu0 %v3341_v50  ;;  %2600 = vmatpush1.bf16.msra.mxu1 %v3345_v54 }
 0x148   :  { %2570 = vmatprep.subr.bf16.mxu0 %v3349_v58  ;;  %2602 = vmatprep.subr.bf16.mxu1 %v3353_v61 }
 0x14b   :  { %2572 = vmatpush1.bf16.msra.mxu0 %v3360_v2  ;;  %2604 = vmatpush1.bf16.msra.mxu1 %v3364_v5 }
 0x14c   :  { %2574 = vmatprep.subr.bf16.mxu0 %v3368_v8  ;;  %2606 = vmatprep.subr.bf16.mxu1 %v3372_v11 }
 0x14f   :  { %2576 = vmatpush1.bf16.msra.mxu0 %v3379_v15  ;;  %2608 = vmatpush1.bf16.msra.mxu1 %v3383_v19 }
 0x150   :  { %2578 = vmatprep.subr.bf16.mxu0 %v3387_v24  ;;  %2610 = vmatprep.subr.bf16.mxu1 %v3391_v28 }
 0x153   :  { %2580 = vmatpush1.bf16.msra.mxu0 %v3398_v33  ;;  %2612 = vmatpush1.bf16.msra.mxu1 %v3402_v39 }
 0x154   :  { %2582 = vmatprep.subr.bf16.mxu0 %v3406_v43  ;;  %2614 = vmatprep.subr.bf16.mxu1 %v3410_v46 }
 0x157   :  { %2584 = vmatpush1.bf16.msra.mxu0 %v3417_v52  ;;  %2616 = vmatpush1.bf16.msra.mxu1 %v3421_v56 }
 0x158   :  { %2586 = vmatprep.subr.bf16.mxu0 %v3425_v60  ;;  %2618 = vmatprep.subr.bf16.mxu1 %v3429_v1 }
 0x15b   :  { %2588 = vmatpush1.bf16.msra.mxu0 %v3436_v4  ;;  %2620 = vmatpush1.bf16.msra.mxu1 %v3440_v6 }
 0x15c   :  { %2622 = vmatprep.subr.bf16.mxu0 %v3553_v59  ;;  %2654 = vmatprep.subr.bf16.mxu1 %v3555_v7 }
 0x211   :  { %v750_v22 = vpop.f32.mrb[2].mxu0  ;;  %v821_v25 = vpop.f32.mrb[2].mxu1 }
 0x212   :  { %v2943_v29 = vadd.f32 %v750_v22, %v3493_v16  ;;  %v752_v34 = vpop.f32.mrb[3].mxu0  ;;  %v823_v35 = vpop.f32.mrb[3].mxu1  ;;  %v2959_v50 = vadd.f32 %v821_v25, %v3499_v32  ;;  %v1127_v22 = vld [vmem:[#allocation5 + $0x68] sm:$0xff]  ;;  %v1125_v25 = vld [vmem:[#allocation5 + $0x58] sm:$0xff] }
 0x213   :  { %v2944_v38 = vadd.f32 %v752_v34, %v3495_v18  ;;  %v2960_v54 = vadd.f32 %v823_v35, %v3502_v41  ;;  %v1129_v34 = vld [vmem:[#allocation5 + $0x78] sm:$0xff]  ;;  %v1122_v35 = vld [vmem:[#allocation5 + $0x40] sm:$0xff] }
 0x214   :  { %v2400_v42 = vmul.f32 -1.442695, %v2943_v29  ;;  %v2402_v20 = vmul.f32 -1.442695, %v2959_v50  ;;  %v3565_v29 = vpack.c.bf16 %v1127_v22, %v1123_v14  ;;  %v1124_v50 = vld [vmem:[#allocation5 + $0x50] sm:$0xff]  ;;  %v1385_v14 = vld [vmem:[#allocation5 + $0xc0] sm:$0xff] }
 0x215   :  { %v2401_v47 = vmul.f32 -1.442695, %v2944_v38  ;;  %v1126_v38 = vld [vmem:[#allocation5 + $0x60] sm:$0xff] }
 0x216   :  { %3029 = vpow2.f32 %v2400_v42  ;;  %v3567_v42 = vpack.c.bf16 %v1129_v34, %v1125_v25  ;;  %v1389_v22 = vld [vmem:[#allocation5 + $0xe0] sm:$0xff] }
 0x217   :  { %3031 = vpow2.f32 %v2401_v47  ;;  %v3569_v47 = vpack.c.bf16 %v1126_v38, %v1122_v35  ;;  %v3635_v34 = vpack.c.bf16 %v1389_v22, %v1385_v14  ;;  %v1387_v35 = vld [vmem:[#allocation5 + $0xd0] sm:$0xff]  ;;  %v1420_v22 = vld [vmem:[#allocation5 + $0x1d8] sm:$0xff] }
 0x218   :  { %3033 = vtanh.f32 %v2960_v54  ;;  %v1128_v54 = vld [vmem:[#allocation5 + $0x70] sm:$0xff] }
 0x219   :  { %3035 = vpow2.f32 %v2402_v20  ;;  %v3572_v20 = vpack.c.bf16 %v1128_v54, %v1124_v50  ;;  %v1391_v38 = vld [vmem:[#allocation5 + $0xf0] sm:$0xff]  ;;  %v1394_v54 = vld [vmem:[#allocation5 + $0x108] sm:$0xff] }
 0x21a   :  { %v3638_v50 = vpack.c.bf16 %v1391_v38, %v1387_v35  ;;  %v1424_v35 = vld [vmem:[#allocation5 + $0x1f8] sm:$0xff]  ;;  %v1417_v38 = vld [vmem:[#allocation5 + $0x1c0] sm:$0xff] }
 0x220   :  { %v3030_v23 = vpop.eup %3029 }
 0x221   :  { %v839_v26 = vadd.f32 1.0, %v3030_v23  ;;  %v3032_v27 = vpop.eup %3031  ;;  %v1131_v23 = vld [vmem:[#allocation5 + $0x88] sm:$0xff] }
 0x222   :  { %v840_v17 = vadd.f32 1.0, %v3032_v27  ;;  %v3034_v21 = vpop.eup %3033  ;;  %v1133_v27 = vld [vmem:[#allocation5 + $0x98] sm:$0xff] }
 0x223   :  { %3037 = vrcp.f32 %v839_v26  ;;  %v3036_v30 = vpop.eup %3035  ;;  %v1135_v26 = vld [vmem:[#allocation5 + $0xa8] sm:$0xff] }
 0x224   :  { %3039 = vrcp.f32 %v840_v17  ;;  %v841_v40 = vadd.f32 1.0, %v3036_v30  ;;  %v3577_v17 = vpack.c.bf16 %v1135_v26, %v1131_v23  ;;  %v1130_v30 = vld [vmem:[#allocation5 + $0x80] sm:$0xff]  ;;  %v1398_v23 = vld [vmem:[#allocation5 + $0x128] sm:$0xff]  ;;  %v1396_v26 = vld [vmem:[#allocation5 + $0x118] sm:$0xff] }
 0x226   :  { %3041 = vrcp.f32 %v841_v40  ;;  %v1132_v40 = vld [vmem:[#allocation5 + $0x90] sm:$0xff] }
 0x22d   :  { %v3038_v31 = vpop.eup %3037 }
 0x22e   :  { %v851_v36 = vmul.f32 %v3038_v31, %v3034_v21  ;;  %v3040_v37 = vpop.eup %3039  ;;  %v1137_v21 = vld [vmem:[#allocation5 + $0xb8] sm:$0xff]  ;;  %v1134_v31 = vld [vmem:[#allocation5 + $0xa0] sm:$0xff] }
 0x22f   :  { %v850_v44 = vmul.f32 %v3040_v37, %v3508_v10  ;;  %v1116_v10 = vld [vmem:[#allocation5 + $0x10] sm:$0xff]  ;;  %v3581_v37 = vpack.c.bf16 %v1134_v31, %v1130_v30  ;;  %v1393_v30 = vld [vmem:[#allocation5 + $0x100] sm:$0xff] }
 0x230   :  { %v3042_v48 = vpop.eup %3041  ;;  %v3560_v13 = vpack.c.bf16 %v1120_v12, %v1116_v10  ;;  %v1392_v12 = vld [vmem:[#allocation5 + $0xf8] sm:$0xff]  ;;  %v1397_v31 = vld [vmem:[#allocation5 + $0x120] sm:$0xff] }
 0x231   :  { %v3548_v45 = vadd.f32 %v851_v36, %v850_v44  ;;  %v3579_v36 = vpack.c.bf16 %v1137_v21, %v1133_v27  ;;  %v1136_v44 = vld [vmem:[#allocation5 + $0xb0] sm:$0xff]  ;;  %v3633_v25 = vpack.c.bf16 %v1392_v12, %v1388_v3  ;;  %v3643_v27 = vpack.c.bf16 %v1398_v23, %v1394_v54  ;;  %v1400_v21 = vld [vmem:[#allocation5 + $0x138] sm:$0xff]  ;;  %v1422_v3 = vld [vmem:[#allocation5 + $0x1e8] sm:$0xff] }
 0x232   :  { %v3679_v54 = vpack.c.bf16 %v1424_v35, %v1420_v22  ;;  %v1421_v23 = vld [vmem:[#allocation5 + $0x1e0] sm:$0xff] }
 0x233   :  { %3043 = vtanh.f32 %v3548_v45 }
 0x23d   :  { %v3044_v49 = vpop.eup %3043 }
 0x23e   :  { %v854_v51 = vmul.f32 %v3044_v49, %v3042_v48  ;;  %v3584_v48 = vpack.c.bf16 %v1136_v44, %v1132_v40  ;;  %v3645_v40 = vpack.c.bf16 %v1400_v21, %v1396_v26  ;;  %v3647_v44 = vpack.c.bf16 %v1397_v31, %v1393_v30  ;;  %v1419_v26 = vld [vmem:[#allocation5 + $0x1d0] sm:$0xff] }
 0x23f   :  { %v1423_v21 = vld [vmem:[#allocation5 + $0x1f0] sm:$0xff]  ;;  %v3682_v30 = vpack.c.bf16 %v1421_v23, %v1417_v38 }
 0x240   :  { %858 = vst [vmem:[#allocation8 + $0x8] sm:$0xff] %v854_v51  ;;  %996 = vmatmul.mubr.f32.vlgmr.msra.gmra.mrb[4].mxu0 %v854_v51  ;;  %1067 = vmatmul.mubr.f32.vlgmr.msra.gmra.mrb[4].mxu1 %v854_v51  ;;  %v3686_v31 = vpack.c.bf16 %v1423_v21, %v1419_v26 }
 0x241   :  { %1242 = vmatprep.mubr.f32.mxu0 %v3216_v0  ;;  %1313 = vmatprep.mubr.f32.mxu1 %v3216_v0 }
 0x242   :  { %2624 = vmatpush1.bf16.msra.mxu0 %v3557_v9  ;;  %2656 = vmatpush1.bf16.msra.mxu1 %v3560_v13 }
 0x243   :  { %2626 = vmatprep.subr.bf16.mxu0 %v3565_v29  ;;  %2658 = vmatprep.subr.bf16.mxu1 %v3567_v42 }
 0x246   :  { %2628 = vmatpush1.bf16.msra.mxu0 %v3569_v47  ;;  %2660 = vmatpush1.bf16.msra.mxu1 %v3572_v20 }
 0x247   :  { %2630 = vmatprep.subr.bf16.mxu0 %v3577_v17  ;;  %2662 = vmatprep.subr.bf16.mxu1 %v3579_v36 }
 0x24a   :  { %2632 = vmatpush1.bf16.msra.mxu0 %v3581_v37  ;;  %2664 = vmatpush1.bf16.msra.mxu1 %v3584_v48 }
 0x24b   :  { %2634 = vmatprep.subr.bf16.mxu0 %v3349_v58  ;;  %2666 = vmatprep.subr.bf16.mxu1 %v3353_v61 }
 0x24e   :  { %2636 = vmatpush1.bf16.msra.mxu0 %v3360_v2  ;;  %2668 = vmatpush1.bf16.msra.mxu1 %v3364_v5 }
 0x24f   :  { %2638 = vmatprep.subr.bf16.mxu0 %v3368_v8  ;;  %2670 = vmatprep.subr.bf16.mxu1 %v3372_v11 }
 0x252   :  { %2640 = vmatpush1.bf16.msra.mxu0 %v3379_v15  ;;  %2672 = vmatpush1.bf16.msra.mxu1 %v3383_v19 }
 0x253   :  { %2642 = vmatprep.subr.bf16.mxu0 %v3387_v24  ;;  %2674 = vmatprep.subr.bf16.mxu1 %v3391_v28 }
 0x256   :  { %2644 = vmatpush1.bf16.msra.mxu0 %v3398_v33  ;;  %2676 = vmatpush1.bf16.msra.mxu1 %v3402_v39 }
 0x257   :  { %2646 = vmatprep.subr.bf16.mxu0 %v3406_v43  ;;  %2678 = vmatprep.subr.bf16.mxu1 %v3410_v46 }
 0x25a   :  { %2648 = vmatpush1.bf16.msra.mxu0 %v3417_v52  ;;  %2680 = vmatpush1.bf16.msra.mxu1 %v3421_v56 }
 0x25b   :  { %2650 = vmatprep.subr.bf16.mxu0 %v3425_v60  ;;  %2682 = vmatprep.subr.bf16.mxu1 %v3429_v1 }
 0x25e   :  { %2652 = vmatpush1.bf16.msra.mxu0 %v3436_v4  ;;  %2684 = vmatpush1.bf16.msra.mxu1 %v3440_v6 }
 0x25f   :  { %2686 = vmatprep.subr.bf16.mxu0 %v3553_v59  ;;  %2718 = vmatprep.subr.bf16.mxu1 %v3555_v7 }
 0x313   :  { %v997_v58 = vpop.f32.mrb[4].mxu0  ;;  %v1068_v61 = vpop.f32.mrb[4].mxu1 }
 0x314   :  { %v2945_v2 = vadd.f32 %v997_v58, %v3493_v16  ;;  %v999_v5 = vpop.f32.mrb[5].mxu0  ;;  %v1070_v8 = vpop.f32.mrb[5].mxu1  ;;  %v2961_v24 = vadd.f32 %v1068_v61, %v3499_v32  ;;  %v1395_v58 = vld [vmem:[#allocation5 + $0x110] sm:$0xff] }
 0x315   :  { %v2946_v11 = vadd.f32 %v999_v5, %v3495_v18  ;;  %v2962_v28 = vadd.f32 %v1070_v8, %v3502_v41  ;;  %v1399_v61 = vld [vmem:[#allocation5 + $0x130] sm:$0xff]  ;;  %v1402_v5 = vld [vmem:[#allocation5 + $0x148] sm:$0xff] }
 0x316   :  { %v2403_v15 = vmul.f32 -1.442695, %v2945_v2  ;;  %v2405_v33 = vmul.f32 -1.442695, %v2961_v24  ;;  %v3650_v2 = vpack.c.bf16 %v1399_v61, %v1395_v58  ;;  %v1406_v8 = vld [vmem:[#allocation5 + $0x168] sm:$0xff]  ;;  %v1401_v24 = vld [vmem:[#allocation5 + $0x140] sm:$0xff] }
 0x317   :  { %v2404_v19 = vmul.f32 -1.442695, %v2946_v11  ;;  %v1404_v11 = vld [vmem:[#allocation5 + $0x158] sm:$0xff] }
 0x318   :  { %3045 = vpow2.f32 %v2403_v15  ;;  %v3655_v15 = vpack.c.bf16 %v1406_v8, %v1402_v5 }
 0x319   :  { %3047 = vpow2.f32 %v2404_v19  ;;  %v1408_v19 = vld [vmem:[#allocation5 + $0x178] sm:$0xff] }
 0x31a   :  { %3049 = vtanh.f32 %v2962_v28  ;;  %v1405_v28 = vld [vmem:[#allocation5 + $0x160] sm:$0xff] }
 0x31b   :  { %3051 = vpow2.f32 %v2405_v33  ;;  %v3657_v33 = vpack.c.bf16 %v1408_v19, %v1404_v11 }
 0x322   :  { %v3046_v39 = vpop.eup %3045 }
 0x323   :  { %v1086_v43 = vadd.f32 1.0, %v3046_v39  ;;  %v3048_v46 = vpop.eup %3047  ;;  %v3659_v39 = vpack.c.bf16 %v1405_v28, %v1401_v24 }
 0x324   :  { %v1087_v52 = vadd.f32 1.0, %v3048_v46  ;;  %v3050_v56 = vpop.eup %3049  ;;  %v1407_v46 = vld [vmem:[#allocation5 + $0x170] sm:$0xff] }
 0x325   :  { %3053 = vrcp.f32 %v1086_v43  ;;  %v3052_v60 = vpop.eup %3051  ;;  %v1403_v43 = vld [vmem:[#allocation5 + $0x150] sm:$0xff] }
 0x326   :  { %3055 = vrcp.f32 %v1087_v52  ;;  %v1088_v49 = vadd.f32 1.0, %v3052_v60  ;;  %v1410_v52 = vld [vmem:[#allocation5 + $0x188] sm:$0xff] }
 0x327   :  { %v1414_v60 = vld [vmem:[#allocation5 + $0x1a8] sm:$0xff] }
 0x328   :  { %3057 = vrcp.f32 %v1088_v49 }
 0x32f   :  { %v3054_v1 = vpop.eup %3053 }
 0x330   :  { %v1098_v4 = vmul.f32 %v3054_v1, %v3050_v56  ;;  %v3056_v6 = vpop.eup %3055  ;;  %v3662_v56 = vpack.c.bf16 %v1407_v46, %v1403_v43  ;;  %v1412_v1 = vld [vmem:[#allocation5 + $0x198] sm:$0xff] }
 0x331   :  { %v1097_v51 = vmul.f32 %v3056_v6, %v3548_v45  ;;  %v1386_v45 = vld [vmem:[#allocation5 + $0xc8] sm:$0xff]  ;;  %v3666_v6 = vpack.c.bf16 %v1414_v60, %v1410_v52 }
 0x332   :  { %v3058_v55 = vpop.eup %3057  ;;  %v3631_v10 = vpack.c.bf16 %v1390_v63, %v1386_v45  ;;  %v1415_v45 = vld [vmem:[#allocation5 + $0x1b0] sm:$0xff]  ;;  %v1418_v63 = vld [vmem:[#allocation5 + $0x1c8] sm:$0xff] }
 0x333   :  { %v3616_v53 = vadd.f32 %v1098_v4, %v1097_v51  ;;  %v1416_v4 = vld [vmem:[#allocation5 + $0x1b8] sm:$0xff]  ;;  %v1409_v51 = vld [vmem:[#allocation5 + $0x180] sm:$0xff]  ;;  %v3677_v14 = vpack.c.bf16 %v1422_v3, %v1418_v63 }
 0x334   :  { %v3668_v49 = vpack.c.bf16 %v1416_v4, %v1412_v1 }
 0x335   :  { %3059 = vtanh.f32 %v3616_v53 }
 0x33f   :  { %v3060_v57 = vpop.eup %3059 }
 0x340   :  { %v1101_v62 = vmul.f32 %v3060_v57, %v3058_v55  ;;  %v1413_v55 = vld [vmem:[#allocation5 + $0x1a0] sm:$0xff]  ;;  %v1411_v57 = vld [vmem:[#allocation5 + $0x190] sm:$0xff] }
 0x341   :  { %v3675_v12 = vpack.c.bf16 %v1415_v45, %v1411_v57 }
 0x342   :  { %1105 = vst [vmem:[#allocation8 + $0x10] sm:$0xff] %v1101_v62  ;;  %1243 = vmatmul.mubr.f32.vlgmr.msra.gmra.mrb[6].mxu0 %v1101_v62  ;;  %1314 = vmatmul.mubr.f32.vlgmr.msra.gmra.mrb[6].mxu1 %v1101_v62  ;;  %v3671_v62 = vpack.c.bf16 %v1413_v55, %v1409_v51 }
 0x343   :  { %2688 = vmatpush1.bf16.msra.mxu0 %v3557_v9  ;;  %2720 = vmatpush1.bf16.msra.mxu1 %v3560_v13 }
 0x344   :  { %2690 = vmatprep.subr.bf16.mxu0 %v3565_v29  ;;  %2722 = vmatprep.subr.bf16.mxu1 %v3567_v42 }
 0x345   :  { %1489 = vmatprep.mubr.f32.mxu0 %v3216_v0  ;;  %1560 = vmatprep.mubr.f32.mxu1 %v3216_v0 }
 0x347   :  { %2692 = vmatpush1.bf16.msra.mxu0 %v3569_v47  ;;  %2724 = vmatpush1.bf16.msra.mxu1 %v3572_v20 }
 0x348   :  { %2694 = vmatprep.subr.bf16.mxu0 %v3577_v17  ;;  %2726 = vmatprep.subr.bf16.mxu1 %v3579_v36 }
 0x34b   :  { %2696 = vmatpush1.bf16.msra.mxu0 %v3581_v37  ;;  %2728 = vmatpush1.bf16.msra.mxu1 %v3584_v48 }
 0x34c   :  { %2698 = vmatprep.subr.bf16.mxu0 %v3631_v10  ;;  %2730 = vmatprep.subr.bf16.mxu1 %v3633_v25 }
 0x34f   :  { %2700 = vmatpush1.bf16.msra.mxu0 %v3635_v34  ;;  %2732 = vmatpush1.bf16.msra.mxu1 %v3638_v50 }
 0x350   :  { %2702 = vmatprep.subr.bf16.mxu0 %v3643_v27  ;;  %2734 = vmatprep.subr.bf16.mxu1 %v3645_v40 }
 0x353   :  { %2704 = vmatpush1.bf16.msra.mxu0 %v3647_v44  ;;  %2736 = vmatpush1.bf16.msra.mxu1 %v3650_v2 }
 0x354   :  { %2706 = vmatprep.subr.bf16.mxu0 %v3655_v15  ;;  %2738 = vmatprep.subr.bf16.mxu1 %v3657_v33 }
 0x357   :  { %2708 = vmatpush1.bf16.msra.mxu0 %v3659_v39  ;;  %2740 = vmatpush1.bf16.msra.mxu1 %v3662_v56 }
 0x358   :  { %2710 = vmatprep.subr.bf16.mxu0 %v3666_v6  ;;  %2742 = vmatprep.subr.bf16.mxu1 %v3668_v49 }
 0x35b   :  { %2712 = vmatpush1.bf16.msra.mxu0 %v3671_v62  ;;  %2744 = vmatpush1.bf16.msra.mxu1 %v3675_v12 }
 0x35c   :  { %2714 = vmatprep.subr.bf16.mxu0 %v3677_v14  ;;  %2746 = vmatprep.subr.bf16.mxu1 %v3679_v54 }
 0x35f   :  { %2716 = vmatpush1.bf16.msra.mxu0 %v3682_v30  ;;  %2748 = vmatpush1.bf16.msra.mxu1 %v3686_v31 }
 0x360   :  { %2750 = vmatprep.subr.bf16.mxu0 %v3553_v59  ;;  %2782 = vmatprep.subr.bf16.mxu1 %v3555_v7 }
 0x415   :  { %v1244_v58 = vpop.f32.mrb[6].mxu0  ;;  %v1315_v61 = vpop.f32.mrb[6].mxu1 }
 0x416   :  { %v2947_v5 = vadd.f32 %v1244_v58, %v3493_v16  ;;  %v1246_v8 = vpop.f32.mrb[7].mxu0  ;;  %v1317_v11 = vpop.f32.mrb[7].mxu1  ;;  %v2963_v43 = vadd.f32 %v1315_v61, %v3499_v32 }
 0x417   :  { %v2948_v19 = vadd.f32 %v1246_v8, %v3495_v18  ;;  %v2964_v46 = vadd.f32 %v1317_v11, %v3502_v41 }
 0x418   :  { %v2406_v24 = vmul.f32 -1.442695, %v2947_v5  ;;  %v2408_v52 = vmul.f32 -1.442695, %v2963_v43 }
 0x419   :  { %v2407_v28 = vmul.f32 -1.442695, %v2948_v19 }
 0x41a   :  { %3061 = vpow2.f32 %v2406_v24 }
 0x41b   :  { %3063 = vpow2.f32 %v2407_v28 }
 0x41c   :  { %3065 = vtanh.f32 %v2964_v46 }
 0x41d   :  { %3067 = vpow2.f32 %v2408_v52 }
 0x424   :  { %v3062_v60 = vpop.eup %3061 }
 0x425   :  { %v1333_v1 = vadd.f32 1.0, %v3062_v60  ;;  %v3064_v4 = vpop.eup %3063 }
 0x426   :  { %v1334_v51 = vadd.f32 1.0, %v3064_v4  ;;  %v3066_v55 = vpop.eup %3065 }
 0x427   :  { %3069 = vrcp.f32 %v1333_v1  ;;  %v3068_v57 = vpop.eup %3067 }
 0x428   :  { %3071 = vrcp.f32 %v1334_v51  ;;  %v1335_v22 = vadd.f32 1.0, %v3068_v57 }
 0x42a   :  { %3073 = vrcp.f32 %v1335_v22 }
 0x431   :  { %v3070_v45 = vpop.eup %3069 }
 0x432   :  { %v1345_v63 = vmul.f32 %v3070_v45, %v3066_v55  ;;  %v3072_v3 = vpop.eup %3071 }
 0x433   :  { %v1344_v35 = vmul.f32 %v3072_v3, %v3616_v53 }
 0x434   :  { %v3074_v23 = vpop.eup %3073 }
 0x435   :  { %v3698_v38 = vadd.f32 %v1345_v63, %v1344_v35 }
 0x437   :  { %3075 = vtanh.f32 %v3698_v38 }
 0x441   :  { %v3076_v26 = vpop.eup %3075 }
 0x442   :  { %v1348_v21 = vmul.f32 %v3076_v26, %v3074_v23 }
 0x444   :  { %1352 = vst [vmem:[#allocation8 + $0x18] sm:$0xff] %v1348_v21  ;;  %1490 = vmatmul.mubr.f32.vlgmr.msra.gmra.mrb[8].mxu0 %v1348_v21  ;;  %1561 = vmatmul.mubr.f32.vlgmr.msra.gmra.mrb[8].mxu1 %v1348_v21 }
 0x445   :  { %2752 = vmatpush1.bf16.msra.mxu0 %v3557_v9  ;;  %2784 = vmatpush1.bf16.msra.mxu1 %v3560_v13 }
 0x446   :  { %2754 = vmatprep.subr.bf16.mxu0 %v3565_v29  ;;  %2786 = vmatprep.subr.bf16.mxu1 %v3567_v42 }
 0x447   :  { %1736 = vmatprep.mubr.f32.mxu0 %v3216_v0  ;;  %1807 = vmatprep.mubr.f32.mxu1 %v3216_v0 }
 0x449   :  { %2756 = vmatpush1.bf16.msra.mxu0 %v3569_v47  ;;  %2788 = vmatpush1.bf16.msra.mxu1 %v3572_v20 }
 0x44a   :  { %2758 = vmatprep.subr.bf16.mxu0 %v3577_v17  ;;  %2790 = vmatprep.subr.bf16.mxu1 %v3579_v36 }
 0x44d   :  { %2760 = vmatpush1.bf16.msra.mxu0 %v3581_v37  ;;  %2792 = vmatpush1.bf16.msra.mxu1 %v3584_v48 }
 0x44e   :  { %2762 = vmatprep.subr.bf16.mxu0 %v3631_v10  ;;  %2794 = vmatprep.subr.bf16.mxu1 %v3633_v25 }
 0x451   :  { %2764 = vmatpush1.bf16.msra.mxu0 %v3635_v34  ;;  %2796 = vmatpush1.bf16.msra.mxu1 %v3638_v50 }
 0x452   :  { %2766 = vmatprep.subr.bf16.mxu0 %v3643_v27  ;;  %2798 = vmatprep.subr.bf16.mxu1 %v3645_v40 }
 0x455   :  { %2768 = vmatpush1.bf16.msra.mxu0 %v3647_v44  ;;  %2800 = vmatpush1.bf16.msra.mxu1 %v3650_v2 }
 0x456   :  { %2770 = vmatprep.subr.bf16.mxu0 %v3655_v15  ;;  %2802 = vmatprep.subr.bf16.mxu1 %v3657_v33 }
 0x459   :  { %2772 = vmatpush1.bf16.msra.mxu0 %v3659_v39  ;;  %2804 = vmatpush1.bf16.msra.mxu1 %v3662_v56 }
 0x45a   :  { %2774 = vmatprep.subr.bf16.mxu0 %v3666_v6  ;;  %2806 = vmatprep.subr.bf16.mxu1 %v3668_v49 }
 0x45d   :  { %2776 = vmatpush1.bf16.msra.mxu0 %v3671_v62  ;;  %2808 = vmatpush1.bf16.msra.mxu1 %v3675_v12 }
 0x45e   :  { %2778 = vmatprep.subr.bf16.mxu0 %v3677_v14  ;;  %2810 = vmatprep.subr.bf16.mxu1 %v3679_v54 }
 0x461   :  { %2780 = vmatpush1.bf16.msra.mxu0 %v3682_v30  ;;  %2812 = vmatpush1.bf16.msra.mxu1 %v3686_v31 }
 0x462   :  { %2814 = vmatprep.subr.bf16.mxu0 %v3553_v59  ;;  %2846 = vmatprep.subr.bf16.mxu1 %v3555_v7 }
 0x517   :  { %v1491_v53 = vpop.f32.mrb[8].mxu0  ;;  %v1562_v58 = vpop.f32.mrb[8].mxu1 }
 0x518   :  { %v2949_v61 = vadd.f32 %v1491_v53, %v3493_v16  ;;  %v1493_v5 = vpop.f32.mrb[9].mxu0  ;;  %v1564_v8 = vpop.f32.mrb[9].mxu1  ;;  %v2965_v28 = vadd.f32 %v1562_v58, %v3499_v32 }
 0x519   :  { %v2950_v11 = vadd.f32 %v1493_v5, %v3495_v18  ;;  %v2966_v43 = vadd.f32 %v1564_v8, %v3502_v41 }
 0x51a   :  { %v2409_v19 = vmul.f32 -1.442695, %v2949_v61  ;;  %v2411_v46 = vmul.f32 -1.442695, %v2965_v28 }
 0x51b   :  { %v2410_v24 = vmul.f32 -1.442695, %v2950_v11 }
 0x51c   :  { %3077 = vpow2.f32 %v2409_v19 }
 0x51d   :  { %3079 = vpow2.f32 %v2410_v24 }
 0x51e   :  { %3081 = vtanh.f32 %v2966_v43 }
 0x51f   :  { %3083 = vpow2.f32 %v2411_v46 }
 0x526   :  { %v3078_v59 = vpop.eup %3077 }
 0x527   :  { %v1580_v52 = vadd.f32 1.0, %v3078_v59  ;;  %v3080_v7 = vpop.eup %3079 }
 0x528   :  { %v1581_v60 = vadd.f32 1.0, %v3080_v7  ;;  %v3082_v1 = vpop.eup %3081  ;;  %v2103_v7 = vld [vmem:[#allocation5 + $0x8] sm:$0xff] }
 0x529   :  { %3085 = vrcp.f32 %v1580_v52  ;;  %v3084_v4 = vpop.eup %3083 }
 0x52a   :  { %3087 = vrcp.f32 %v1581_v60  ;;  %v1582_v45 = vadd.f32 1.0, %v3084_v4  ;;  %v2107_v60 = vld [vmem:[#allocation5 + $0x28] sm:$0xff] }
 0x52b   :  { %v2877_v4 = vpack.c.bf16 %v2107_v60, %v2103_v7 }
 0x52c   :  { %3089 = vrcp.f32 %v1582_v45 }
 0x533   :  { %v3086_v51 = vpop.eup %3085 }
 0x534   :  { %v1592_v55 = vmul.f32 %v3086_v51, %v3082_v1  ;;  %v3088_v57 = vpop.eup %3087  ;;  %v2105_v1 = vld [vmem:[#allocation5 + $0x18] sm:$0xff] }
 0x535   :  { %v1591_v63 = vmul.f32 %v3088_v57, %v3698_v38  ;;  %v2109_v51 = vld [vmem:[#allocation5 + $0x38] sm:$0xff]  ;;  %v2106_v57 = vld [vmem:[#allocation5 + $0x20] sm:$0xff] }
 0x536   :  { %v3090_v22 = vpop.eup %3089  ;;  %v2909_v45 = vpack.c.bf16 %v2109_v51, %v2105_v1 }
 0x537   :  { %v3740_v3 = vadd.f32 %v1592_v55, %v1591_v63  ;;  %v2102_v55 = vld [vmem:[#allocation5] sm:$0xff] }
 0x538   :  { %v2879_v63 = vpack.c.bf16 %v2106_v57, %v2102_v55 }
 0x539   :  { %3091 = vtanh.f32 %v3740_v3 }
 0x543   :  { %v3092_v35 = vpop.eup %3091 }
 0x544   :  { %v1595_v23 = vmul.f32 %v3092_v35, %v3090_v22  ;;  %v2108_v22 = vld [vmem:[#allocation5 + $0x30] sm:$0xff] }
 0x546   :  { %1599 = vst [vmem:[#allocation8 + $0x20] sm:$0xff] %v1595_v23  ;;  %1737 = vmatmul.mubr.f32.vlgmr.msra.gmra.mrb[10].mxu0 %v1595_v23  ;;  %1808 = vmatmul.mubr.f32.vlgmr.msra.gmra.mrb[10].mxu1 %v1595_v23  ;;  %v2111_v23 = vld [vmem:[#allocation5 + $0x48] sm:$0xff] }
 0x547   :  { %2816 = vmatpush1.bf16.msra.mxu0 %v3557_v9  ;;  %2848 = vmatpush1.bf16.msra.mxu1 %v3560_v13 }
 0x548   :  { %2818 = vmatprep.subr.bf16.mxu0 %v3565_v29  ;;  %2850 = vmatprep.subr.bf16.mxu1 %v3567_v42 }
 0x549   :  { %1983 = vmatprep.mubr.f32.mxu0 %v3216_v0  ;;  %2054 = vmatprep.mubr.f32.mxu1 %v3216_v0 }
 0x54b   :  { %2820 = vmatpush1.bf16.msra.mxu0 %v3569_v47  ;;  %2852 = vmatpush1.bf16.msra.mxu1 %v3572_v20 }
 0x54c   :  { %2822 = vmatprep.subr.bf16.mxu0 %v3577_v17  ;;  %2854 = vmatprep.subr.bf16.mxu1 %v3579_v36 }
 0x54f   :  { %2824 = vmatpush1.bf16.msra.mxu0 %v3581_v37  ;;  %2856 = vmatpush1.bf16.msra.mxu1 %v3584_v48 }
 0x550   :  { %2826 = vmatprep.subr.bf16.mxu0 %v3631_v10  ;;  %2858 = vmatprep.subr.bf16.mxu1 %v3633_v25 }
 0x553   :  { %2828 = vmatpush1.bf16.msra.mxu0 %v3635_v34  ;;  %2860 = vmatpush1.bf16.msra.mxu1 %v3638_v50 }
 0x554   :  { %2830 = vmatprep.subr.bf16.mxu0 %v3643_v27  ;;  %2862 = vmatprep.subr.bf16.mxu1 %v3645_v40 }
 0x557   :  { %2832 = vmatpush1.bf16.msra.mxu0 %v3647_v44  ;;  %2864 = vmatpush1.bf16.msra.mxu1 %v3650_v2 }
 0x558   :  { %2834 = vmatprep.subr.bf16.mxu0 %v3655_v15  ;;  %2866 = vmatprep.subr.bf16.mxu1 %v3657_v33 }
 0x55b   :  { %2836 = vmatpush1.bf16.msra.mxu0 %v3659_v39  ;;  %2868 = vmatpush1.bf16.msra.mxu1 %v3662_v56 }
 0x55c   :  { %2838 = vmatprep.subr.bf16.mxu0 %v3666_v6  ;;  %2870 = vmatprep.subr.bf16.mxu1 %v3668_v49 }
 0x55f   :  { %2840 = vmatpush1.bf16.msra.mxu0 %v3671_v62  ;;  %2872 = vmatpush1.bf16.msra.mxu1 %v3675_v12 }
 0x560   :  { %2842 = vmatprep.subr.bf16.mxu0 %v3677_v14  ;;  %2874 = vmatprep.subr.bf16.mxu1 %v3679_v54 }
 0x563   :  { %2844 = vmatpush1.bf16.msra.mxu0 %v3682_v30  ;;  %2876 = vmatpush1.bf16.msra.mxu1 %v3686_v31 }
 0x564   :  { %2878 = vmatprep.subr.bf16.mxu0 %v2877_v4  ;;  %2910 = vmatprep.subr.bf16.mxu1 %v2909_v45 }
 0x619   :  { %v1738_v9 = vpop.f32.mrb[10].mxu0  ;;  %v1809_v13 = vpop.f32.mrb[10].mxu1 }
 0x61a   :  { %v2951_v29 = vadd.f32 %v1738_v9, %v3493_v16  ;;  %v1740_v42 = vpop.f32.mrb[11].mxu0  ;;  %v1811_v47 = vpop.f32.mrb[11].mxu1  ;;  %v2967_v37 = vadd.f32 %v1809_v13, %v3499_v32  ;;  %v2115_v9 = vld [vmem:[#allocation5 + $0x68] sm:$0xff]  ;;  %v2113_v13 = vld [vmem:[#allocation5 + $0x58] sm:$0xff] }
 0x61b   :  { %v2952_v20 = vadd.f32 %v1740_v42, %v3495_v18  ;;  %v2968_v48 = vadd.f32 %v1811_v47, %v3502_v41  ;;  %v2110_v42 = vld [vmem:[#allocation5 + $0x40] sm:$0xff] }
 0x61c   :  { %v2412_v17 = vmul.f32 -1.442695, %v2951_v29  ;;  %v2414_v38 = vmul.f32 -1.442695, %v2967_v37  ;;  %v2117_v29 = vld [vmem:[#allocation5 + $0x78] sm:$0xff]  ;;  %v2114_v47 = vld [vmem:[#allocation5 + $0x60] sm:$0xff] }
 0x61d   :  { %v2413_v36 = vmul.f32 -1.442695, %v2952_v20  ;;  %v2913_v20 = vpack.c.bf16 %v2117_v29, %v2113_v13  ;;  %v2116_v37 = vld [vmem:[#allocation5 + $0x70] sm:$0xff] }
 0x61e   :  { %3093 = vpow2.f32 %v2412_v17  ;;  %v2883_v17 = vpack.c.bf16 %v2114_v47, %v2110_v42 }
 0x61f   :  { %3095 = vpow2.f32 %v2413_v36  ;;  %v2112_v36 = vld [vmem:[#allocation5 + $0x50] sm:$0xff] }
 0x620   :  { %3097 = vtanh.f32 %v2968_v48  ;;  %v2915_v48 = vpack.c.bf16 %v2116_v37, %v2112_v36 }
 0x621   :  { %3099 = vpow2.f32 %v2414_v38  ;;  %v2119_v38 = vld [vmem:[#allocation5 + $0x88] sm:$0xff] }
 0x628   :  { %v3094_v26 = vpop.eup %3093 }
 0x629   :  { %v1827_v21 = vadd.f32 1.0, %v3094_v26  ;;  %v3096_v53 = vpop.eup %3095  ;;  %v2123_v26 = vld [vmem:[#allocation5 + $0xa8] sm:$0xff] }
 0x62a   :  { %v1828_v58 = vadd.f32 1.0, %v3096_v53  ;;  %v3098_v61 = vpop.eup %3097  ;;  %v2885_v53 = vpack.c.bf16 %v2123_v26, %v2119_v38 }
 0x62b   :  { %3101 = vrcp.f32 %v1827_v21  ;;  %v3100_v5 = vpop.eup %3099  ;;  %v2121_v21 = vld [vmem:[#allocation5 + $0x98] sm:$0xff] }
 0x62c   :  { %3103 = vrcp.f32 %v1828_v58  ;;  %v1829_v24 = vadd.f32 1.0, %v3100_v5  ;;  %v2125_v58 = vld [vmem:[#allocation5 + $0xb8] sm:$0xff]  ;;  %v2122_v5 = vld [vmem:[#allocation5 + $0xa0] sm:$0xff] }
 0x62e   :  { %3105 = vrcp.f32 %v1829_v24  ;;  %v2124_v24 = vld [vmem:[#allocation5 + $0xb0] sm:$0xff] }
 0x635   :  { %v3102_v8 = vpop.eup %3101 }
 0x636   :  { %v1839_v11 = vmul.f32 %v3102_v8, %v3098_v61  ;;  %v3104_v19 = vpop.eup %3103  ;;  %v2118_v61 = vld [vmem:[#allocation5 + $0x80] sm:$0xff]  ;;  %v2917_v8 = vpack.c.bf16 %v2125_v58, %v2121_v21 }
 0x637   :  { %v1838_v28 = vmul.f32 %v3104_v19, %v3740_v3  ;;  %v2104_v3 = vld [vmem:[#allocation5 + $0x10] sm:$0xff] }
 0x638   :  { %v3106_v46 = vpop.eup %3105  ;;  %v2911_v35 = vpack.c.bf16 %v2108_v22, %v2104_v3  ;;  %v2120_v19 = vld [vmem:[#allocation5 + $0x90] sm:$0xff] }
 0x639   :  { %v3780_v43 = vadd.f32 %v1839_v11, %v1838_v28  ;;  %v2887_v11 = vpack.c.bf16 %v2122_v5, %v2118_v61  ;;  %v2919_v28 = vpack.c.bf16 %v2124_v24, %v2120_v19 }
 0x63b   :  { %3107 = vtanh.f32 %v3780_v43 }
 0x645   :  { %v3108_v59 = vpop.eup %3107 }
 0x646   :  { %v1842_v52 = vmul.f32 %v3108_v59, %v3106_v46 }
 0x648   :  { %1846 = vst [vmem:[#allocation8 + $0x28] sm:$0xff] %v1842_v52  ;;  %1984 = vmatmul.mubr.f32.vlgmr.msra.gmra.mrb[12].mxu0 %v1842_v52  ;;  %2055 = vmatmul.mubr.f32.vlgmr.msra.gmra.mrb[12].mxu1 %v1842_v52 }
 0x649   :  { %2230 = vmatprep.mubr.f32.mxu0 %v3216_v0  ;;  %2301 = vmatprep.mubr.f32.mxu1 %v3216_v0  ;;  %v2881_v0 = vpack.c.bf16 %v2115_v9, %v2111_v23 }
 0x64a   :  { %2880 = vmatpush1.bf16.msra.mxu0 %v2879_v63  ;;  %2912 = vmatpush1.bf16.msra.mxu1 %v2911_v35 }
 0x64b   :  { %2882 = vmatprep.subr.bf16.mxu0 %v2881_v0  ;;  %2914 = vmatprep.subr.bf16.mxu1 %v2913_v20 }
 0x64e   :  { %2884 = vmatpush1.bf16.msra.mxu0 %v2883_v17  ;;  %2916 = vmatpush1.bf16.msra.mxu1 %v2915_v48 }
 0x64f   :  { %2886 = vmatprep.subr.bf16.mxu0 %v2885_v53  ;;  %2918 = vmatprep.subr.bf16.mxu1 %v2917_v8 }
 0x652   :  { %2888 = vmatpush1.bf16.msra.mxu0 %v2887_v11  ;;  %2920 = vmatpush1.bf16.msra.mxu1 %v2919_v28 }
 0x653   :  { %2890 = vmatprep.subr.bf16.mxu0 %v3631_v10  ;;  %2922 = vmatprep.subr.bf16.mxu1 %v3633_v25 }
 0x656   :  { %2892 = vmatpush1.bf16.msra.mxu0 %v3635_v34  ;;  %2924 = vmatpush1.bf16.msra.mxu1 %v3638_v50 }
 0x657   :  { %2894 = vmatprep.subr.bf16.mxu0 %v3643_v27  ;;  %2926 = vmatprep.subr.bf16.mxu1 %v3645_v40 }
 0x65a   :  { %2896 = vmatpush1.bf16.msra.mxu0 %v3647_v44  ;;  %2928 = vmatpush1.bf16.msra.mxu1 %v3650_v2 }
 0x65b   :  { %2898 = vmatprep.subr.bf16.mxu0 %v3655_v15  ;;  %2930 = vmatprep.subr.bf16.mxu1 %v3657_v33 }
 0x65e   :  { %2900 = vmatpush1.bf16.msra.mxu0 %v3659_v39  ;;  %2932 = vmatpush1.bf16.msra.mxu1 %v3662_v56 }
 0x65f   :  { %2902 = vmatprep.subr.bf16.mxu0 %v3666_v6  ;;  %2934 = vmatprep.subr.bf16.mxu1 %v3668_v49 }
 0x662   :  { %2904 = vmatpush1.bf16.msra.mxu0 %v3671_v62  ;;  %2936 = vmatpush1.bf16.msra.mxu1 %v3675_v12 }
 0x663   :  { %2906 = vmatprep.subr.bf16.mxu0 %v3677_v14  ;;  %2938 = vmatprep.subr.bf16.mxu1 %v3679_v54 }
 0x666   :  { %2908 = vmatpush1.bf16.msra.mxu0 %v3682_v30  ;;  %2940 = vmatpush1.bf16.msra.mxu1 %v3686_v31 }
 0x71b   :  { %v1985_v10 = vpop.f32.mrb[12].mxu0  ;;  %v2056_v25 = vpop.f32.mrb[12].mxu1 }
 0x71c   :  { %v2953_v34 = vadd.f32 %v1985_v10, %v3493_v16  ;;  %v1987_v50 = vpop.f32.mrb[13].mxu0  ;;  %v2058_v27 = vpop.f32.mrb[13].mxu1  ;;  %v2969_v15 = vadd.f32 %v2056_v25, %v3499_v32 }
 0x71d   :  { %v2954_v40 = vadd.f32 %v1987_v50, %v3495_v18  ;;  %v2970_v33 = vadd.f32 %v2058_v27, %v3502_v41 }
 0x71e   :  { %v2415_v44 = vmul.f32 -1.442695, %v2953_v34  ;;  %v2417_v39 = vmul.f32 -1.442695, %v2969_v15 }
 0x71f   :  { %v2416_v2 = vmul.f32 -1.442695, %v2954_v40 }
 0x720   :  { %3109 = vpow2.f32 %v2415_v44 }
 0x721   :  { %3111 = vpow2.f32 %v2416_v2 }
 0x722   :  { %3113 = vtanh.f32 %v2970_v33 }
 0x723   :  { %3115 = vpow2.f32 %v2417_v39 }
 0x72a   :  { %v3110_v56 = vpop.eup %3109 }
 0x72b   :  { %v2074_v6 = vadd.f32 1.0, %v3110_v56  ;;  %v3112_v49 = vpop.eup %3111 }
 0x72c   :  { %v2075_v62 = vadd.f32 1.0, %v3112_v49  ;;  %v3114_v12 = vpop.eup %3113 }
 0x72d   :  { %3117 = vrcp.f32 %v2074_v6  ;;  %v3116_v14 = vpop.eup %3115 }
 0x72e   :  { %3119 = vrcp.f32 %v2075_v62  ;;  %v2076_v46 = vadd.f32 1.0, %v3116_v14 }
 0x730   :  { %3121 = vrcp.f32 %v2076_v46 }
 0x737   :  { %v3118_v54 = vpop.eup %3117 }
 0x738   :  { %v2086_v30 = vmul.f32 %v3118_v54, %v3114_v12  ;;  %v3120_v31 = vpop.eup %3119 }
 0x739   :  { %v2085_v59 = vmul.f32 %v3120_v31, %v3780_v43 }
 0x73a   :  { %v3122_v7 = vpop.eup %3121 }
 0x73b   :  { %v2087_v52 = vadd.f32 %v2086_v30, %v2085_v59 }
 0x73d   :  { %3123 = vtanh.f32 %v2087_v52 }
 0x747   :  { %v3124_v60 = vpop.eup %3123 }
 0x748   :  { %v2089_v1 = vmul.f32 %v3124_v60, %v3122_v7 }
 0x74a   :  { %2093 = vst [vmem:[#allocation8 + $0x30] sm:$0xff] %v2089_v1  ;;  %2231 = vmatmul.mubr.f32.vlgmr.msra.gmra.mrb[14].mxu0 %v2089_v1  ;;  %2302 = vmatmul.mubr.f32.vlgmr.msra.gmra.mrb[14].mxu1 %v2089_v1 }
 0x81d   :  { %v2232_v4 = vpop.f32.mrb[14].mxu0  ;;  %v2303_v51 = vpop.f32.mrb[14].mxu1 }
 0x81e   :  { %v2955_v55 = vadd.f32 %v2232_v4, %v3493_v16  ;;  %v2234_v57 = vpop.f32.mrb[15].mxu0  ;;  %v2305_v45 = vpop.f32.mrb[15].mxu1  ;;  %v2971_v43 = vadd.f32 %v2303_v51, %v3499_v32 }
 0x81f   :  { %v2956_v63 = vadd.f32 %v2234_v57, %v3495_v18  ;;  %v2972_v35 = vadd.f32 %v2305_v45, %v3502_v41 }
 0x820   :  { %v2418_v3 = vmul.f32 -1.442695, %v2955_v55  ;;  %v2420_v23 = vmul.f32 -1.442695, %v2971_v43 }
 0x821   :  { %v2419_v22 = vmul.f32 -1.442695, %v2956_v63 }
 0x822   :  { %3125 = vpow2.f32 %v2418_v3 }
 0x823   :  { %3127 = vpow2.f32 %v2419_v22 }
 0x824   :  { %3129 = vtanh.f32 %v2972_v35 }
 0x825   :  { %3131 = vpow2.f32 %v2420_v23 }
 0x82c   :  { %v3126_v9 = vpop.eup %3125 }
 0x82d   :  { %v2321_v13 = vadd.f32 1.0, %v3126_v9  ;;  %v3128_v0 = vpop.eup %3127 }
 0x82e   :  { %v2322_v16 = vadd.f32 1.0, %v3128_v0  ;;  %v3130_v29 = vpop.eup %3129 }
 0x82f   :  { %3133 = vrcp.f32 %v2321_v13  ;;  %v3132_v42 = vpop.eup %3131 }
 0x830   :  { %3135 = vrcp.f32 %v2322_v16  ;;  %v2323_v17 = vadd.f32 1.0, %v3132_v42 }
 0x832   :  { %3137 = vrcp.f32 %v2323_v17 }
 0x839   :  { %v3134_v18 = vpop.eup %3133 }
 0x83a   :  { %v2333_v47 = vmul.f32 %v3134_v18, %v3130_v29  ;;  %v3136_v20 = vpop.eup %3135 }
 0x83b   :  { %v2332_v32 = vmul.f32 %v3136_v20, %v2087_v52 }
 0x83d   :  { %v2334_v36 = vadd.f32 %v2333_v47, %v2332_v32 }
 0x83f   :  { %3139 = vtanh.f32 %v2334_v36  ;;  %2342 = vst [vmem:[#allocation9] sm:$0xff] %v2334_v36 }
 0x840   :  { %3174 = shalt.err (!%p3171_p12)
}
 0x841   :  { %s3175_s28 = scalar_lea.hbm %s3845_s7, 128 }
 0x842   :  { %p3176_p13 = scmp.ne.s32.totalorder %s3845_s7, %s3175_s28  ;;  %p3179_p0 = scmp.lt.u32.totalorder %s3175_s28, %s3845_s7 }
 0x844   :  { %p3181_p1 = pnand %p3179_p0, %p3176_p13 }
 0x846   :  { %3184 = shalt.err (!%p3181_p1)
}
 0x847   :  { %2364 = dma.vmem_to_hbm [thread:$0]  %s2362_s24, 128, %s3845_s7, [#allocation10]   ;;  %v3138_v41 = vpop.eup %3137 }
 0x848   :  { %s3218_s11 = smov [#allocation8]  }
 0x849   :  { %s2348_s12 = sshll.u32 %s3218_s11, 4  ;;  %v3140_v37 = vpop.eup %3139  ;;  %s2349_s12 = int_to_ptr.vmem [resolvable:$true] %s2348_s12 }
 0x84a   :  { %v2336_v48 = vmul.f32 %v3140_v37, %v3138_v41  ;;  %s3185_s13 = scalar_lea.vmem %s2349_s12, 1024  ;;  %p3190_p3 = scmp.lt.s32.totalorder %s2349_s12, %s2349_s12 }
 0x84b   :  { %p3186_p2 = scmp.ne.s32.totalorder %s2349_s12, %s3185_s13  ;;  %p3191_p4 = scmp.lt.s32.totalorder %s3185_s13, %s3185_s13 }
 0x84c   :  { %2340 = vst [vmem:[#allocation8 + $0x38] sm:$0xff] %v2336_v48 }
 0x84d   :  { %p3192_p5 = por %p3191_p4, %p3190_p3 }
 0x84f   :  { %p3193_p6 = pnand %p3192_p5, %p3186_p2 }
 0x851   :  { %3196 = shalt.err (!%p3193_p6)
}
 0x852   :  { %s3197_s16 = scalar_lea.hbm %s3844_s6, 1024 }
 0x853   :  { %p3198_p7 = scmp.ne.s32.totalorder %s3844_s6, %s3197_s16  ;;  %p3201_p8 = scmp.lt.u32.totalorder %s3197_s16, %s3844_s6 }
 0x855   :  { %p3203_p9 = pnand %p3201_p8, %p3198_p7 }
 0x857   :  { %3206 = shalt.err (!%p3203_p9)
}
 0x858   :  { %s3219_s20 = smov 128   ;;  %s3220_s5 = smov 8  }
 0x859   :  { %2354 = dma.vmem_to_hbm [thread:$0]  %s2349_s12, 1024, %s3844_s6, [#allocation7], %s3219_s20, %s3219_s20, %s3220_s5  }
 0x85a   :  { %3209 = dma.done.wait [#allocation7], 1024  }
 0x85b   :  { %3210 = vsyncadd [#allocation7], 4294966272 }
 0x85c   :  { %3211 = dma.done.wait [#allocation10], 128  }
 0x85d   :  { %3212 = vsyncadd [#allocation10], 4294967168 }
 0x85e   :  { %2371 = vsyncpa [#allocation6], 1 }
 0x85f   :  { %2372 = vsyncpa [#allocation7], 1 }
 0x860   :  { %2373 = vsyncpa [#allocation10], 1 }

</bundles_post_ra>
